<compile_context>
chip_gen: v7x
topology: tpu7x:2x2x1
jax: 0.10.0
libtpu: 0.0.40
codegen_flags: <defaults>
</compile_context>

<pallas_src>
import functools

import jax
import jax.numpy as jnp
from jax.experimental import pallas as pl
from jax.experimental.pallas import tpu as pltpu


def bow_kernel(idx_ref, table_ref, out_ref, *, count_dtype):
    # idx_ref:   (TM, Cp)  int32    one M-tile of packed word-group rows
    # table_ref: (Vp, Dp)  f32/bf16 full block-diagonal, lane-padded table
    # out_ref:   (TM, Dp)  f32
    idx = idx_ref[...]
    TM, Cp = idx.shape
    Vp = table_ref.shape[0]

    # Per-row vocab counts, accumulated one packed-char column at a time
    # (live intermediate stays (TM, Vp), never (TM, Cp, Vp)).
    # NOTE: for Cp >> 64 switch this to lax.fori_loop to bound live ranges.
    vocab_ids = jax.lax.broadcasted_iota(jnp.int32, (TM, Vp), 1)
    counts = jnp.zeros((TM, Vp), count_dtype)
    for c in range(Cp):                      # Cp is small & static
        counts = counts + (idx[:, c:c + 1] == vocab_ids).astype(count_dtype)

    # Bag-of-chars embedding sum == counts @ table: one MXU matmul, f32 acc.
    out_ref[...] = jnp.dot(
        counts.astype(table_ref.dtype), table_ref[...],
        preferred_element_type=jnp.float32,
    ).astype(out_ref.dtype)


def _round_up(x, m):
    return ((x + m - 1) // m) * m


@functools.partial(jax.jit, static_argnames=("tm", "compute_dtype"))
def bow_encoder_forward(indices, table, l=None, *, tm=512, compute_dtype=None):
    """Pallas forward pass of bow_encoder.

    indices: (B, W, C) integer char ids (out-of-range ids contribute zero).
    table:   (V, D) embedding table (padding_idx row assumed pre-zeroed).
    l:       lengths, accepted but unused (matches the PyTorch forward).
    tm:      requested M-tile (rows of the batched matmul); multiple of 8.
    compute_dtype: optional MXU/VALU dtype (jnp.bfloat16 recommended on
             v5e/v6e/v7x; counts stay exact for C <= 256).
    """
    del l  # unused, as in the reference PyTorch forward
    B, W, C = indices.shape
    V, D = table.shape

    # --- word-packing factor: G words share one 128-lane output row ----------
    if D < 128 and 128 % D == 0:
        G = 128 // D
        Dp = 128                             # = G * D, no zero columns written
    else:
        G = 1
        Dp = _round_up(D, 128)               # fallback: lane-pad the embed dim

    N = B * W
    Npack = _round_up(N, G)                  # word rows padded to group size
    Ng = Npack // G                          # packed M rows
    Cp = G * C                               # packed char columns
    Vp = _round_up(G * V, 128)               # lane-dense MXU contraction dim

    # --- M tile: large (amortize per-step overhead) but keep >=2 grid blocks -
    tm = max(8, _round_up(int(tm), 8))
    tm = min(tm, max(8, _round_up(pl.cdiv(Ng, 2), 8)))   # v7x: 2 TCs want >=2
    Np = _round_up(Ng, tm)

    # --- pack indices ---------------------------------------------------------
    idx = indices.reshape(N, C).astype(jnp.int32)
    if Npack != N:
        # Sentinel stays negative even after the +g*V group offset below.
        idx = jnp.pad(idx, ((0, Npack - N), (0, 0)), constant_values=-(G * V))
    offs = (jnp.arange(G, dtype=jnp.int32) * V).reshape(1, G, 1)
    idx = (idx.reshape(Ng, G, C) + offs).reshape(Ng, Cp)
    if Np != Ng:
        idx = jnp.pad(idx, ((0, Np - Ng), (0, 0)), constant_values=-1)

    # --- block-diagonal, padded table ----------------------------------------
    tab = table if compute_dtype is None else table.astype(compute_dtype)
    if G > 1:
        tab = jnp.kron(jnp.eye(G, dtype=tab.dtype), tab)   # (G*V, G*D)
    if Dp != tab.shape[1]:
        tab = jnp.pad(tab, ((0, 0), (0, Dp - tab.shape[1])))
    if Vp != tab.shape[0]:
        tab = jnp.pad(tab, ((0, Vp - tab.shape[0]), (0, 0)))

    # bf16 count accumulation is exact while per-word counts <= 256.
    count_dtype = (jnp.bfloat16
                   if (tab.dtype == jnp.bfloat16 and C <= 256)
                   else jnp.float32)

    # --- VMEM budget: 2x idx/out blocks, resident table, counts + temps ------
    tab_bytes = jnp.dtype(tab.dtype).itemsize
    cnt_bytes = jnp.dtype(count_dtype).itemsize
    vmem_est = (2 * tm * Cp * 4 + 2 * Vp * Dp * tab_bytes
                + 2 * tm * Dp * 4 + 2 * tm * Vp * cnt_bytes)
    vmem_limit = int(min(max(2 * vmem_est, 8 << 20), 40 << 20))

    out = pl.pallas_call(
        functools.partial(bow_kernel, count_dtype=count_dtype),
        out_shape=jax.ShapeDtypeStruct((Np, Dp), jnp.float32),
        grid_spec=pltpu.PrefetchScalarGridSpec(
            num_scalar_prefetch=0,
            grid=(Np // tm,),
            in_specs=[
                pl.BlockSpec((tm, Cp), lambda i: (i, 0)),   # M-tile of indices
                # Constant index_map -> fetched once, kept resident in VMEM.
                pl.BlockSpec((Vp, Dp), lambda i: (0, 0)),
            ],
            out_specs=pl.BlockSpec((tm, Dp), lambda i: (i, 0)),
        ),
        compiler_params=pltpu.CompilerParams(
            dimension_semantics=("parallel",),
            vmem_limit_bytes=vmem_limit,
        ),
    )(idx, tab)

    # Undo packing / padding: pure reshapes plus a cheap row trim.
    if G > 1:
        res = out[:Ng].reshape(Npack, D)[:N]
    else:
        res = out[:N, :D]
    return res.reshape(B, W, D)


if __name__ == "__main__":
    # config['embed'] equivalents (small, synthetic):
    num_chars = 64          # vocab size
    embedding_dim = 32
    padding_idx = 0

    # Input shape implied by forward: (batch, n_words, n_chars)
    B, W, C = 2, 8, 16

    key = jax.random.PRNGKey(0)
    k_tab, k_idx = jax.random.split(key)

    # Deterministic embedding weights (nn.Embedding default: N(0,1)),
    # with the padding_idx row zeroed out.
    table = jax.random.normal(k_tab, (num_chars, embedding_dim), dtype=jnp.float32)
    table = table.at[padding_idx].set(0.0)

    # Random char indices, including some padding entries.
    indices = jax.random.randint(k_idx, (B, W, C), 0, num_chars, dtype=jnp.int32)
    # lengths `l` is accepted but unused by the forward pass.
    lengths = jnp.full((B,), W, dtype=jnp.int32)

    # f32 path (bit-faithful to the PyTorch f32 gather+sum).
    out = bow_encoder_forward(indices, table, lengths)
    out = jax.block_until_ready(out)
    ref = jnp.take(table, indices, axis=0).sum(axis=2)
    assert out.shape == (B, W, embedding_dim)
    assert jnp.allclose(out, ref, atol=1e-5, rtol=1e-5)

    # bf16 MXU/VALU path (recommended default on v5e/v6e/v7x); counts stay
    # exact in bf16, so only the table cast changes results.
    out_bf16 = bow_encoder_forward(indices, table, lengths,
                                   compute_dtype=jnp.bfloat16)
    out_bf16 = jax.block_until_ready(out_bf16)
    ref_bf16 = jnp.take(table.astype(jnp.bfloat16).astype(jnp.float32),
                        indices, axis=0).sum(axis=2)
    assert jnp.allclose(out_bf16, ref_bf16, atol=1e-3, rtol=1e-3)

    print("KERNEL_OK")
</pallas_src>

<mosaic_0001>
module attributes {stable_mosaic.version = 11 : i64} {
  func.func @bow_kernel(%arg0: i32, %arg1: memref<8x64xi32, #tpu.memory_space<vmem>>, %arg2: memref<256x128xf32, #tpu.memory_space<vmem>>, %arg3: memref<8x128xf32, #tpu.memory_space<vmem>>) attributes {dimension_semantics = [#tpu.dimension_semantics<parallel>], iteration_bounds = array<i64: 1>, scalar_prefetch = 0 : i64, scratch_operands = 0 : i64, tpu.core_type = #tpu.core_type<tc>, window_params = [{transform_indices = @transform_0, window_bounds = array<i64: 8, 64>}, {pipeline_mode = #tpu.pipeline_mode<synchronous>, transform_indices = @transform_1, window_bounds = array<i64: 256, 128>}, {transform_indices = @transform_2, window_bounds = array<i64: 8, 128>}]} {
    %c0 = arith.constant 0 : index
    %c0_0 = arith.constant 0 : index
    %0 = vector.load %arg1[%c0, %c0_0] : memref<8x64xi32, #tpu.memory_space<vmem>>, vector<8x64xi32>
    %1 = tpu.iota {dimensions = array<i32: 1>} : vector<8x256xi32>
    %cst = arith.constant 0.000000e+00 : f32
    %2 = vector.broadcast %cst : f32 to vector<8x256xf32>
    %3 = vector.extract_strided_slice %0 {offsets = [0, 0], sizes = [8, 1], strides = [1, 1]} : vector<8x64xi32> to vector<8x1xi32>
    %4 = vector.broadcast %3 : vector<8x1xi32> to vector<8x256xi32>
    %5 = arith.cmpi eq, %4, %1 : vector<8x256xi32>
    %6 = arith.extui %5 : vector<8x256xi1> to vector<8x256xi32>
    %7 = arith.sitofp %6 : vector<8x256xi32> to vector<8x256xf32>
    %8 = arith.addf %2, %7 : vector<8x256xf32>
    %9 = vector.extract_strided_slice %0 {offsets = [0, 1], sizes = [8, 1], strides = [1, 1]} : vector<8x64xi32> to vector<8x1xi32>
    %10 = vector.broadcast %9 : vector<8x1xi32> to vector<8x256xi32>
    %11 = arith.cmpi eq, %10, %1 : vector<8x256xi32>
    %12 = arith.extui %11 : vector<8x256xi1> to vector<8x256xi32>
    %13 = arith.sitofp %12 : vector<8x256xi32> to vector<8x256xf32>
    %14 = arith.addf %8, %13 : vector<8x256xf32>
    %15 = vector.extract_strided_slice %0 {offsets = [0, 2], sizes = [8, 1], strides = [1, 1]} : vector<8x64xi32> to vector<8x1xi32>
    %16 = vector.broadcast %15 : vector<8x1xi32> to vector<8x256xi32>
    %17 = arith.cmpi eq, %16, %1 : vector<8x256xi32>
    %18 = arith.extui %17 : vector<8x256xi1> to vector<8x256xi32>
    %19 = arith.sitofp %18 : vector<8x256xi32> to vector<8x256xf32>
    %20 = arith.addf %14, %19 : vector<8x256xf32>
    %21 = vector.extract_strided_slice %0 {offsets = [0, 3], sizes = [8, 1], strides = [1, 1]} : vector<8x64xi32> to vector<8x1xi32>
    %22 = vector.broadcast %21 : vector<8x1xi32> to vector<8x256xi32>
    %23 = arith.cmpi eq, %22, %1 : vector<8x256xi32>
    %24 = arith.extui %23 : vector<8x256xi1> to vector<8x256xi32>
    %25 = arith.sitofp %24 : vector<8x256xi32> to vector<8x256xf32>
    %26 = arith.addf %20, %25 : vector<8x256xf32>
    %27 = vector.extract_strided_slice %0 {offsets = [0, 4], sizes = [8, 1], strides = [1, 1]} : vector<8x64xi32> to vector<8x1xi32>
    %28 = vector.broadcast %27 : vector<8x1xi32> to vector<8x256xi32>
    %29 = arith.cmpi eq, %28, %1 : vector<8x256xi32>
    %30 = arith.extui %29 : vector<8x256xi1> to vector<8x256xi32>
    %31 = arith.sitofp %30 : vector<8x256xi32> to vector<8x256xf32>
    %32 = arith.addf %26, %31 : vector<8x256xf32>
    %33 = vector.extract_strided_slice %0 {offsets = [0, 5], sizes = [8, 1], strides = [1, 1]} : vector<8x64xi32> to vector<8x1xi32>
    %34 = vector.broadcast %33 : vector<8x1xi32> to vector<8x256xi32>
    %35 = arith.cmpi eq, %34, %1 : vector<8x256xi32>
    %36 = arith.extui %35 : vector<8x256xi1> to vector<8x256xi32>
    %37 = arith.sitofp %36 : vector<8x256xi32> to vector<8x256xf32>
    %38 = arith.addf %32, %37 : vector<8x256xf32>
    %39 = vector.extract_strided_slice %0 {offsets = [0, 6], sizes = [8, 1], strides = [1, 1]} : vector<8x64xi32> to vector<8x1xi32>
    %40 = vector.broadcast %39 : vector<8x1xi32> to vector<8x256xi32>
    %41 = arith.cmpi eq, %40, %1 : vector<8x256xi32>
    %42 = arith.extui %41 : vector<8x256xi1> to vector<8x256xi32>
    %43 = arith.sitofp %42 : vector<8x256xi32> to vector<8x256xf32>
    %44 = arith.addf %38, %43 : vector<8x256xf32>
    %45 = vector.extract_strided_slice %0 {offsets = [0, 7], sizes = [8, 1], strides = [1, 1]} : vector<8x64xi32> to vector<8x1xi32>
    %46 = vector.broadcast %45 : vector<8x1xi32> to vector<8x256xi32>
    %47 = arith.cmpi eq, %46, %1 : vector<8x256xi32>
    %48 = arith.extui %47 : vector<8x256xi1> to vector<8x256xi32>
    %49 = arith.sitofp %48 : vector<8x256xi32> to vector<8x256xf32>
    %50 = arith.addf %44, %49 : vector<8x256xf32>
    %51 = vector.extract_strided_slice %0 {offsets = [0, 8], sizes = [8, 1], strides = [1, 1]} : vector<8x64xi32> to vector<8x1xi32>
    %52 = vector.broadcast %51 : vector<8x1xi32> to vector<8x256xi32>
    %53 = arith.cmpi eq, %52, %1 : vector<8x256xi32>
    %54 = arith.extui %53 : vector<8x256xi1> to vector<8x256xi32>
    %55 = arith.sitofp %54 : vector<8x256xi32> to vector<8x256xf32>
    %56 = arith.addf %50, %55 : vector<8x256xf32>
    %57 = vector.extract_strided_slice %0 {offsets = [0, 9], sizes = [8, 1], strides = [1, 1]} : vector<8x64xi32> to vector<8x1xi32>
    %58 = vector.broadcast %57 : vector<8x1xi32> to vector<8x256xi32>
    %59 = arith.cmpi eq, %58, %1 : vector<8x256xi32>
    %60 = arith.extui %59 : vector<8x256xi1> to vector<8x256xi32>
    %61 = arith.sitofp %60 : vector<8x256xi32> to vector<8x256xf32>
    %62 = arith.addf %56, %61 : vector<8x256xf32>
    %63 = vector.extract_strided_slice %0 {offsets = [0, 10], sizes = [8, 1], strides = [1, 1]} : vector<8x64xi32> to vector<8x1xi32>
    %64 = vector.broadcast %63 : vector<8x1xi32> to vector<8x256xi32>
    %65 = arith.cmpi eq, %64, %1 : vector<8x256xi32>
    %66 = arith.extui %65 : vector<8x256xi1> to vector<8x256xi32>
    %67 = arith.sitofp %66 : vector<8x256xi32> to vector<8x256xf32>
    %68 = arith.addf %62, %67 : vector<8x256xf32>
    %69 = vector.extract_strided_slice %0 {offsets = [0, 11], sizes = [8, 1], strides = [1, 1]} : vector<8x64xi32> to vector<8x1xi32>
    %70 = vector.broadcast %69 : vector<8x1xi32> to vector<8x256xi32>
    %71 = arith.cmpi eq, %70, %1 : vector<8x256xi32>
    %72 = arith.extui %71 : vector<8x256xi1> to vector<8x256xi32>
    %73 = arith.sitofp %72 : vector<8x256xi32> to vector<8x256xf32>
    %74 = arith.addf %68, %73 : vector<8x256xf32>
    %75 = vector.extract_strided_slice %0 {offsets = [0, 12], sizes = [8, 1], strides = [1, 1]} : vector<8x64xi32> to vector<8x1xi32>
    %76 = vector.broadcast %75 : vector<8x1xi32> to vector<8x256xi32>
    %77 = arith.cmpi eq, %76, %1 : vector<8x256xi32>
    %78 = arith.extui %77 : vector<8x256xi1> to vector<8x256xi32>
    %79 = arith.sitofp %78 : vector<8x256xi32> to vector<8x256xf32>
    %80 = arith.addf %74, %79 : vector<8x256xf32>
    %81 = vector.extract_strided_slice %0 {offsets = [0, 13], sizes = [8, 1], strides = [1, 1]} : vector<8x64xi32> to vector<8x1xi32>
    %82 = vector.broadcast %81 : vector<8x1xi32> to vector<8x256xi32>
    %83 = arith.cmpi eq, %82, %1 : vector<8x256xi32>
    %84 = arith.extui %83 : vector<8x256xi1> to vector<8x256xi32>
    %85 = arith.sitofp %84 : vector<8x256xi32> to vector<8x256xf32>
    %86 = arith.addf %80, %85 : vector<8x256xf32>
    %87 = vector.extract_strided_slice %0 {offsets = [0, 14], sizes = [8, 1], strides = [1, 1]} : vector<8x64xi32> to vector<8x1xi32>
    %88 = vector.broadcast %87 : vector<8x1xi32> to vector<8x256xi32>
    %89 = arith.cmpi eq, %88, %1 : vector<8x256xi32>
    %90 = arith.extui %89 : vector<8x256xi1> to vector<8x256xi32>
    %91 = arith.sitofp %90 : vector<8x256xi32> to vector<8x256xf32>
    %92 = arith.addf %86, %91 : vector<8x256xf32>
    %93 = vector.extract_strided_slice %0 {offsets = [0, 15], sizes = [8, 1], strides = [1, 1]} : vector<8x64xi32> to vector<8x1xi32>
    %94 = vector.broadcast %93 : vector<8x1xi32> to vector<8x256xi32>
    %95 = arith.cmpi eq, %94, %1 : vector<8x256xi32>
    %96 = arith.extui %95 : vector<8x256xi1> to vector<8x256xi32>
    %97 = arith.sitofp %96 : vector<8x256xi32> to vector<8x256xf32>
    %98 = arith.addf %92, %97 : vector<8x256xf32>
    %99 = vector.extract_strided_slice %0 {offsets = [0, 16], sizes = [8, 1], strides = [1, 1]} : vector<8x64xi32> to vector<8x1xi32>
    %100 = vector.broadcast %99 : vector<8x1xi32> to vector<8x256xi32>
    %101 = arith.cmpi eq, %100, %1 : vector<8x256xi32>
    %102 = arith.extui %101 : vector<8x256xi1> to vector<8x256xi32>
    %103 = arith.sitofp %102 : vector<8x256xi32> to vector<8x256xf32>
    %104 = arith.addf %98, %103 : vector<8x256xf32>
    %105 = vector.extract_strided_slice %0 {offsets = [0, 17], sizes = [8, 1], strides = [1, 1]} : vector<8x64xi32> to vector<8x1xi32>
    %106 = vector.broadcast %105 : vector<8x1xi32> to vector<8x256xi32>
    %107 = arith.cmpi eq, %106, %1 : vector<8x256xi32>
    %108 = arith.extui %107 : vector<8x256xi1> to vector<8x256xi32>
    %109 = arith.sitofp %108 : vector<8x256xi32> to vector<8x256xf32>
    %110 = arith.addf %104, %109 : vector<8x256xf32>
    %111 = vector.extract_strided_slice %0 {offsets = [0, 18], sizes = [8, 1], strides = [1, 1]} : vector<8x64xi32> to vector<8x1xi32>
    %112 = vector.broadcast %111 : vector<8x1xi32> to vector<8x256xi32>
    %113 = arith.cmpi eq, %112, %1 : vector<8x256xi32>
    %114 = arith.extui %113 : vector<8x256xi1> to vector<8x256xi32>
    %115 = arith.sitofp %114 : vector<8x256xi32> to vector<8x256xf32>
    %116 = arith.addf %110, %115 : vector<8x256xf32>
    %117 = vector.extract_strided_slice %0 {offsets = [0, 19], sizes = [8, 1], strides = [1, 1]} : vector<8x64xi32> to vector<8x1xi32>
    %118 = vector.broadcast %117 : vector<8x1xi32> to vector<8x256xi32>
    %119 = arith.cmpi eq, %118, %1 : vector<8x256xi32>
    %120 = arith.extui %119 : vector<8x256xi1> to vector<8x256xi32>
    %121 = arith.sitofp %120 : vector<8x256xi32> to vector<8x256xf32>
    %122 = arith.addf %116, %121 : vector<8x256xf32>
    %123 = vector.extract_strided_slice %0 {offsets = [0, 20], sizes = [8, 1], strides = [1, 1]} : vector<8x64xi32> to vector<8x1xi32>
    %124 = vector.broadcast %123 : vector<8x1xi32> to vector<8x256xi32>
    %125 = arith.cmpi eq, %124, %1 : vector<8x256xi32>
    %126 = arith.extui %125 : vector<8x256xi1> to vector<8x256xi32>
    %127 = arith.sitofp %126 : vector<8x256xi32> to vector<8x256xf32>
    %128 = arith.addf %122, %127 : vector<8x256xf32>
    %129 = vector.extract_strided_slice %0 {offsets = [0, 21], sizes = [8, 1], strides = [1, 1]} : vector<8x64xi32> to vector<8x1xi32>
    %130 = vector.broadcast %129 : vector<8x1xi32> to vector<8x256xi32>
    %131 = arith.cmpi eq, %130, %1 : vector<8x256xi32>
    %132 = arith.extui %131 : vector<8x256xi1> to vector<8x256xi32>
    %133 = arith.sitofp %132 : vector<8x256xi32> to vector<8x256xf32>
    %134 = arith.addf %128, %133 : vector<8x256xf32>
    %135 = vector.extract_strided_slice %0 {offsets = [0, 22], sizes = [8, 1], strides = [1, 1]} : vector<8x64xi32> to vector<8x1xi32>
    %136 = vector.broadcast %135 : vector<8x1xi32> to vector<8x256xi32>
    %137 = arith.cmpi eq, %136, %1 : vector<8x256xi32>
    %138 = arith.extui %137 : vector<8x256xi1> to vector<8x256xi32>
    %139 = arith.sitofp %138 : vector<8x256xi32> to vector<8x256xf32>
    %140 = arith.addf %134, %139 : vector<8x256xf32>
    %141 = vector.extract_strided_slice %0 {offsets = [0, 23], sizes = [8, 1], strides = [1, 1]} : vector<8x64xi32> to vector<8x1xi32>
    %142 = vector.broadcast %141 : vector<8x1xi32> to vector<8x256xi32>
    %143 = arith.cmpi eq, %142, %1 : vector<8x256xi32>
    %144 = arith.extui %143 : vector<8x256xi1> to vector<8x256xi32>
    %145 = arith.sitofp %144 : vector<8x256xi32> to vector<8x256xf32>
    %146 = arith.addf %140, %145 : vector<8x256xf32>
    %147 = vector.extract_strided_slice %0 {offsets = [0, 24], sizes = [8, 1], strides = [1, 1]} : vector<8x64xi32> to vector<8x1xi32>
    %148 = vector.broadcast %147 : vector<8x1xi32> to vector<8x256xi32>
    %149 = arith.cmpi eq, %148, %1 : vector<8x256xi32>
    %150 = arith.extui %149 : vector<8x256xi1> to vector<8x256xi32>
    %151 = arith.sitofp %150 : vector<8x256xi32> to vector<8x256xf32>
    %152 = arith.addf %146, %151 : vector<8x256xf32>
    %153 = vector.extract_strided_slice %0 {offsets = [0, 25], sizes = [8, 1], strides = [1, 1]} : vector<8x64xi32> to vector<8x1xi32>
    %154 = vector.broadcast %153 : vector<8x1xi32> to vector<8x256xi32>
    %155 = arith.cmpi eq, %154, %1 : vector<8x256xi32>
    %156 = arith.extui %155 : vector<8x256xi1> to vector<8x256xi32>
    %157 = arith.sitofp %156 : vector<8x256xi32> to vector<8x256xf32>
    %158 = arith.addf %152, %157 : vector<8x256xf32>
    %159 = vector.extract_strided_slice %0 {offsets = [0, 26], sizes = [8, 1], strides = [1, 1]} : vector<8x64xi32> to vector<8x1xi32>
    %160 = vector.broadcast %159 : vector<8x1xi32> to vector<8x256xi32>
    %161 = arith.cmpi eq, %160, %1 : vector<8x256xi32>
    %162 = arith.extui %161 : vector<8x256xi1> to vector<8x256xi32>
    %163 = arith.sitofp %162 : vector<8x256xi32> to vector<8x256xf32>
    %164 = arith.addf %158, %163 : vector<8x256xf32>
    %165 = vector.extract_strided_slice %0 {offsets = [0, 27], sizes = [8, 1], strides = [1, 1]} : vector<8x64xi32> to vector<8x1xi32>
    %166 = vector.broadcast %165 : vector<8x1xi32> to vector<8x256xi32>
    %167 = arith.cmpi eq, %166, %1 : vector<8x256xi32>
    %168 = arith.extui %167 : vector<8x256xi1> to vector<8x256xi32>
    %169 = arith.sitofp %168 : vector<8x256xi32> to vector<8x256xf32>
    %170 = arith.addf %164, %169 : vector<8x256xf32>
    %171 = vector.extract_strided_slice %0 {offsets = [0, 28], sizes = [8, 1], strides = [1, 1]} : vector<8x64xi32> to vector<8x1xi32>
    %172 = vector.broadcast %171 : vector<8x1xi32> to vector<8x256xi32>
    %173 = arith.cmpi eq, %172, %1 : vector<8x256xi32>
    %174 = arith.extui %173 : vector<8x256xi1> to vector<8x256xi32>
    %175 = arith.sitofp %174 : vector<8x256xi32> to vector<8x256xf32>
    %176 = arith.addf %170, %175 : vector<8x256xf32>
    %177 = vector.extract_strided_slice %0 {offsets = [0, 29], sizes = [8, 1], strides = [1, 1]} : vector<8x64xi32> to vector<8x1xi32>
    %178 = vector.broadcast %177 : vector<8x1xi32> to vector<8x256xi32>
    %179 = arith.cmpi eq, %178, %1 : vector<8x256xi32>
    %180 = arith.extui %179 : vector<8x256xi1> to vector<8x256xi32>
    %181 = arith.sitofp %180 : vector<8x256xi32> to vector<8x256xf32>
    %182 = arith.addf %176, %181 : vector<8x256xf32>
    %183 = vector.extract_strided_slice %0 {offsets = [0, 30], sizes = [8, 1], strides = [1, 1]} : vector<8x64xi32> to vector<8x1xi32>
    %184 = vector.broadcast %183 : vector<8x1xi32> to vector<8x256xi32>
    %185 = arith.cmpi eq, %184, %1 : vector<8x256xi32>
    %186 = arith.extui %185 : vector<8x256xi1> to vector<8x256xi32>
    %187 = arith.sitofp %186 : vector<8x256xi32> to vector<8x256xf32>
    %188 = arith.addf %182, %187 : vector<8x256xf32>
    %189 = vector.extract_strided_slice %0 {offsets = [0, 31], sizes = [8, 1], strides = [1, 1]} : vector<8x64xi32> to vector<8x1xi32>
    %190 = vector.broadcast %189 : vector<8x1xi32> to vector<8x256xi32>
    %191 = arith.cmpi eq, %190, %1 : vector<8x256xi32>
    %192 = arith.extui %191 : vector<8x256xi1> to vector<8x256xi32>
    %193 = arith.sitofp %192 : vector<8x256xi32> to vector<8x256xf32>
    %194 = arith.addf %188, %193 : vector<8x256xf32>
    %195 = vector.extract_strided_slice %0 {offsets = [0, 32], sizes = [8, 1], strides = [1, 1]} : vector<8x64xi32> to vector<8x1xi32>
    %196 = vector.broadcast %195 : vector<8x1xi32> to vector<8x256xi32>
    %197 = arith.cmpi eq, %196, %1 : vector<8x256xi32>
    %198 = arith.extui %197 : vector<8x256xi1> to vector<8x256xi32>
    %199 = arith.sitofp %198 : vector<8x256xi32> to vector<8x256xf32>
    %200 = arith.addf %194, %199 : vector<8x256xf32>
    %201 = vector.extract_strided_slice %0 {offsets = [0, 33], sizes = [8, 1], strides = [1, 1]} : vector<8x64xi32> to vector<8x1xi32>
    %202 = vector.broadcast %201 : vector<8x1xi32> to vector<8x256xi32>
    %203 = arith.cmpi eq, %202, %1 : vector<8x256xi32>
    %204 = arith.extui %203 : vector<8x256xi1> to vector<8x256xi32>
    %205 = arith.sitofp %204 : vector<8x256xi32> to vector<8x256xf32>
    %206 = arith.addf %200, %205 : vector<8x256xf32>
    %207 = vector.extract_strided_slice %0 {offsets = [0, 34], sizes = [8, 1], strides = [1, 1]} : vector<8x64xi32> to vector<8x1xi32>
    %208 = vector.broadcast %207 : vector<8x1xi32> to vector<8x256xi32>
    %209 = arith.cmpi eq, %208, %1 : vector<8x256xi32>
    %210 = arith.extui %209 : vector<8x256xi1> to vector<8x256xi32>
    %211 = arith.sitofp %210 : vector<8x256xi32> to vector<8x256xf32>
    %212 = arith.addf %206, %211 : vector<8x256xf32>
    %213 = vector.extract_strided_slice %0 {offsets = [0, 35], sizes = [8, 1], strides = [1, 1]} : vector<8x64xi32> to vector<8x1xi32>
    %214 = vector.broadcast %213 : vector<8x1xi32> to vector<8x256xi32>
    %215 = arith.cmpi eq, %214, %1 : vector<8x256xi32>
    %216 = arith.extui %215 : vector<8x256xi1> to vector<8x256xi32>
    %217 = arith.sitofp %216 : vector<8x256xi32> to vector<8x256xf32>
    %218 = arith.addf %212, %217 : vector<8x256xf32>
    %219 = vector.extract_strided_slice %0 {offsets = [0, 36], sizes = [8, 1], strides = [1, 1]} : vector<8x64xi32> to vector<8x1xi32>
    %220 = vector.broadcast %219 : vector<8x1xi32> to vector<8x256xi32>
    %221 = arith.cmpi eq, %220, %1 : vector<8x256xi32>
    %222 = arith.extui %221 : vector<8x256xi1> to vector<8x256xi32>
    %223 = arith.sitofp %222 : vector<8x256xi32> to vector<8x256xf32>
    %224 = arith.addf %218, %223 : vector<8x256xf32>
    %225 = vector.extract_strided_slice %0 {offsets = [0, 37], sizes = [8, 1], strides = [1, 1]} : vector<8x64xi32> to vector<8x1xi32>
    %226 = vector.broadcast %225 : vector<8x1xi32> to vector<8x256xi32>
    %227 = arith.cmpi eq, %226, %1 : vector<8x256xi32>
    %228 = arith.extui %227 : vector<8x256xi1> to vector<8x256xi32>
    %229 = arith.sitofp %228 : vector<8x256xi32> to vector<8x256xf32>
    %230 = arith.addf %224, %229 : vector<8x256xf32>
    %231 = vector.extract_strided_slice %0 {offsets = [0, 38], sizes = [8, 1], strides = [1, 1]} : vector<8x64xi32> to vector<8x1xi32>
    %232 = vector.broadcast %231 : vector<8x1xi32> to vector<8x256xi32>
    %233 = arith.cmpi eq, %232, %1 : vector<8x256xi32>
    %234 = arith.extui %233 : vector<8x256xi1> to vector<8x256xi32>
    %235 = arith.sitofp %234 : vector<8x256xi32> to vector<8x256xf32>
    %236 = arith.addf %230, %235 : vector<8x256xf32>
    %237 = vector.extract_strided_slice %0 {offsets = [0, 39], sizes = [8, 1], strides = [1, 1]} : vector<8x64xi32> to vector<8x1xi32>
    %238 = vector.broadcast %237 : vector<8x1xi32> to vector<8x256xi32>
    %239 = arith.cmpi eq, %238, %1 : vector<8x256xi32>
    %240 = arith.extui %239 : vector<8x256xi1> to vector<8x256xi32>
    %241 = arith.sitofp %240 : vector<8x256xi32> to vector<8x256xf32>
    %242 = arith.addf %236, %241 : vector<8x256xf32>
    %243 = vector.extract_strided_slice %0 {offsets = [0, 40], sizes = [8, 1], strides = [1, 1]} : vector<8x64xi32> to vector<8x1xi32>
    %244 = vector.broadcast %243 : vector<8x1xi32> to vector<8x256xi32>
    %245 = arith.cmpi eq, %244, %1 : vector<8x256xi32>
    %246 = arith.extui %245 : vector<8x256xi1> to vector<8x256xi32>
    %247 = arith.sitofp %246 : vector<8x256xi32> to vector<8x256xf32>
    %248 = arith.addf %242, %247 : vector<8x256xf32>
    %249 = vector.extract_strided_slice %0 {offsets = [0, 41], sizes = [8, 1], strides = [1, 1]} : vector<8x64xi32> to vector<8x1xi32>
    %250 = vector.broadcast %249 : vector<8x1xi32> to vector<8x256xi32>
    %251 = arith.cmpi eq, %250, %1 : vector<8x256xi32>
    %252 = arith.extui %251 : vector<8x256xi1> to vector<8x256xi32>
    %253 = arith.sitofp %252 : vector<8x256xi32> to vector<8x256xf32>
    %254 = arith.addf %248, %253 : vector<8x256xf32>
    %255 = vector.extract_strided_slice %0 {offsets = [0, 42], sizes = [8, 1], strides = [1, 1]} : vector<8x64xi32> to vector<8x1xi32>
    %256 = vector.broadcast %255 : vector<8x1xi32> to vector<8x256xi32>
    %257 = arith.cmpi eq, %256, %1 : vector<8x256xi32>
    %258 = arith.extui %257 : vector<8x256xi1> to vector<8x256xi32>
    %259 = arith.sitofp %258 : vector<8x256xi32> to vector<8x256xf32>
    %260 = arith.addf %254, %259 : vector<8x256xf32>
    %261 = vector.extract_strided_slice %0 {offsets = [0, 43], sizes = [8, 1], strides = [1, 1]} : vector<8x64xi32> to vector<8x1xi32>
    %262 = vector.broadcast %261 : vector<8x1xi32> to vector<8x256xi32>
    %263 = arith.cmpi eq, %262, %1 : vector<8x256xi32>
    %264 = arith.extui %263 : vector<8x256xi1> to vector<8x256xi32>
    %265 = arith.sitofp %264 : vector<8x256xi32> to vector<8x256xf32>
    %266 = arith.addf %260, %265 : vector<8x256xf32>
    %267 = vector.extract_strided_slice %0 {offsets = [0, 44], sizes = [8, 1], strides = [1, 1]} : vector<8x64xi32> to vector<8x1xi32>
    %268 = vector.broadcast %267 : vector<8x1xi32> to vector<8x256xi32>
    %269 = arith.cmpi eq, %268, %1 : vector<8x256xi32>
    %270 = arith.extui %269 : vector<8x256xi1> to vector<8x256xi32>
    %271 = arith.sitofp %270 : vector<8x256xi32> to vector<8x256xf32>
    %272 = arith.addf %266, %271 : vector<8x256xf32>
    %273 = vector.extract_strided_slice %0 {offsets = [0, 45], sizes = [8, 1], strides = [1, 1]} : vector<8x64xi32> to vector<8x1xi32>
    %274 = vector.broadcast %273 : vector<8x1xi32> to vector<8x256xi32>
    %275 = arith.cmpi eq, %274, %1 : vector<8x256xi32>
    %276 = arith.extui %275 : vector<8x256xi1> to vector<8x256xi32>
    %277 = arith.sitofp %276 : vector<8x256xi32> to vector<8x256xf32>
    %278 = arith.addf %272, %277 : vector<8x256xf32>
    %279 = vector.extract_strided_slice %0 {offsets = [0, 46], sizes = [8, 1], strides = [1, 1]} : vector<8x64xi32> to vector<8x1xi32>
    %280 = vector.broadcast %279 : vector<8x1xi32> to vector<8x256xi32>
    %281 = arith.cmpi eq, %280, %1 : vector<8x256xi32>
    %282 = arith.extui %281 : vector<8x256xi1> to vector<8x256xi32>
    %283 = arith.sitofp %282 : vector<8x256xi32> to vector<8x256xf32>
    %284 = arith.addf %278, %283 : vector<8x256xf32>
    %285 = vector.extract_strided_slice %0 {offsets = [0, 47], sizes = [8, 1], strides = [1, 1]} : vector<8x64xi32> to vector<8x1xi32>
    %286 = vector.broadcast %285 : vector<8x1xi32> to vector<8x256xi32>
    %287 = arith.cmpi eq, %286, %1 : vector<8x256xi32>
    %288 = arith.extui %287 : vector<8x256xi1> to vector<8x256xi32>
    %289 = arith.sitofp %288 : vector<8x256xi32> to vector<8x256xf32>
    %290 = arith.addf %284, %289 : vector<8x256xf32>
    %291 = vector.extract_strided_slice %0 {offsets = [0, 48], sizes = [8, 1], strides = [1, 1]} : vector<8x64xi32> to vector<8x1xi32>
    %292 = vector.broadcast %291 : vector<8x1xi32> to vector<8x256xi32>
    %293 = arith.cmpi eq, %292, %1 : vector<8x256xi32>
    %294 = arith.extui %293 : vector<8x256xi1> to vector<8x256xi32>
    %295 = arith.sitofp %294 : vector<8x256xi32> to vector<8x256xf32>
    %296 = arith.addf %290, %295 : vector<8x256xf32>
    %297 = vector.extract_strided_slice %0 {offsets = [0, 49], sizes = [8, 1], strides = [1, 1]} : vector<8x64xi32> to vector<8x1xi32>
    %298 = vector.broadcast %297 : vector<8x1xi32> to vector<8x256xi32>
    %299 = arith.cmpi eq, %298, %1 : vector<8x256xi32>
    %300 = arith.extui %299 : vector<8x256xi1> to vector<8x256xi32>
    %301 = arith.sitofp %300 : vector<8x256xi32> to vector<8x256xf32>
    %302 = arith.addf %296, %301 : vector<8x256xf32>
    %303 = vector.extract_strided_slice %0 {offsets = [0, 50], sizes = [8, 1], strides = [1, 1]} : vector<8x64xi32> to vector<8x1xi32>
    %304 = vector.broadcast %303 : vector<8x1xi32> to vector<8x256xi32>
    %305 = arith.cmpi eq, %304, %1 : vector<8x256xi32>
    %306 = arith.extui %305 : vector<8x256xi1> to vector<8x256xi32>
    %307 = arith.sitofp %306 : vector<8x256xi32> to vector<8x256xf32>
    %308 = arith.addf %302, %307 : vector<8x256xf32>
    %309 = vector.extract_strided_slice %0 {offsets = [0, 51], sizes = [8, 1], strides = [1, 1]} : vector<8x64xi32> to vector<8x1xi32>
    %310 = vector.broadcast %309 : vector<8x1xi32> to vector<8x256xi32>
    %311 = arith.cmpi eq, %310, %1 : vector<8x256xi32>
    %312 = arith.extui %311 : vector<8x256xi1> to vector<8x256xi32>
    %313 = arith.sitofp %312 : vector<8x256xi32> to vector<8x256xf32>
    %314 = arith.addf %308, %313 : vector<8x256xf32>
    %315 = vector.extract_strided_slice %0 {offsets = [0, 52], sizes = [8, 1], strides = [1, 1]} : vector<8x64xi32> to vector<8x1xi32>
    %316 = vector.broadcast %315 : vector<8x1xi32> to vector<8x256xi32>
    %317 = arith.cmpi eq, %316, %1 : vector<8x256xi32>
    %318 = arith.extui %317 : vector<8x256xi1> to vector<8x256xi32>
    %319 = arith.sitofp %318 : vector<8x256xi32> to vector<8x256xf32>
    %320 = arith.addf %314, %319 : vector<8x256xf32>
    %321 = vector.extract_strided_slice %0 {offsets = [0, 53], sizes = [8, 1], strides = [1, 1]} : vector<8x64xi32> to vector<8x1xi32>
    %322 = vector.broadcast %321 : vector<8x1xi32> to vector<8x256xi32>
    %323 = arith.cmpi eq, %322, %1 : vector<8x256xi32>
    %324 = arith.extui %323 : vector<8x256xi1> to vector<8x256xi32>
    %325 = arith.sitofp %324 : vector<8x256xi32> to vector<8x256xf32>
    %326 = arith.addf %320, %325 : vector<8x256xf32>
    %327 = vector.extract_strided_slice %0 {offsets = [0, 54], sizes = [8, 1], strides = [1, 1]} : vector<8x64xi32> to vector<8x1xi32>
    %328 = vector.broadcast %327 : vector<8x1xi32> to vector<8x256xi32>
    %329 = arith.cmpi eq, %328, %1 : vector<8x256xi32>
    %330 = arith.extui %329 : vector<8x256xi1> to vector<8x256xi32>
    %331 = arith.sitofp %330 : vector<8x256xi32> to vector<8x256xf32>
    %332 = arith.addf %326, %331 : vector<8x256xf32>
    %333 = vector.extract_strided_slice %0 {offsets = [0, 55], sizes = [8, 1], strides = [1, 1]} : vector<8x64xi32> to vector<8x1xi32>
    %334 = vector.broadcast %333 : vector<8x1xi32> to vector<8x256xi32>
    %335 = arith.cmpi eq, %334, %1 : vector<8x256xi32>
    %336 = arith.extui %335 : vector<8x256xi1> to vector<8x256xi32>
    %337 = arith.sitofp %336 : vector<8x256xi32> to vector<8x256xf32>
    %338 = arith.addf %332, %337 : vector<8x256xf32>
    %339 = vector.extract_strided_slice %0 {offsets = [0, 56], sizes = [8, 1], strides = [1, 1]} : vector<8x64xi32> to vector<8x1xi32>
    %340 = vector.broadcast %339 : vector<8x1xi32> to vector<8x256xi32>
    %341 = arith.cmpi eq, %340, %1 : vector<8x256xi32>
    %342 = arith.extui %341 : vector<8x256xi1> to vector<8x256xi32>
    %343 = arith.sitofp %342 : vector<8x256xi32> to vector<8x256xf32>
    %344 = arith.addf %338, %343 : vector<8x256xf32>
    %345 = vector.extract_strided_slice %0 {offsets = [0, 57], sizes = [8, 1], strides = [1, 1]} : vector<8x64xi32> to vector<8x1xi32>
    %346 = vector.broadcast %345 : vector<8x1xi32> to vector<8x256xi32>
    %347 = arith.cmpi eq, %346, %1 : vector<8x256xi32>
    %348 = arith.extui %347 : vector<8x256xi1> to vector<8x256xi32>
    %349 = arith.sitofp %348 : vector<8x256xi32> to vector<8x256xf32>
    %350 = arith.addf %344, %349 : vector<8x256xf32>
    %351 = vector.extract_strided_slice %0 {offsets = [0, 58], sizes = [8, 1], strides = [1, 1]} : vector<8x64xi32> to vector<8x1xi32>
    %352 = vector.broadcast %351 : vector<8x1xi32> to vector<8x256xi32>
    %353 = arith.cmpi eq, %352, %1 : vector<8x256xi32>
    %354 = arith.extui %353 : vector<8x256xi1> to vector<8x256xi32>
    %355 = arith.sitofp %354 : vector<8x256xi32> to vector<8x256xf32>
    %356 = arith.addf %350, %355 : vector<8x256xf32>
    %357 = vector.extract_strided_slice %0 {offsets = [0, 59], sizes = [8, 1], strides = [1, 1]} : vector<8x64xi32> to vector<8x1xi32>
    %358 = vector.broadcast %357 : vector<8x1xi32> to vector<8x256xi32>
    %359 = arith.cmpi eq, %358, %1 : vector<8x256xi32>
    %360 = arith.extui %359 : vector<8x256xi1> to vector<8x256xi32>
    %361 = arith.sitofp %360 : vector<8x256xi32> to vector<8x256xf32>
    %362 = arith.addf %356, %361 : vector<8x256xf32>
    %363 = vector.extract_strided_slice %0 {offsets = [0, 60], sizes = [8, 1], strides = [1, 1]} : vector<8x64xi32> to vector<8x1xi32>
    %364 = vector.broadcast %363 : vector<8x1xi32> to vector<8x256xi32>
    %365 = arith.cmpi eq, %364, %1 : vector<8x256xi32>
    %366 = arith.extui %365 : vector<8x256xi1> to vector<8x256xi32>
    %367 = arith.sitofp %366 : vector<8x256xi32> to vector<8x256xf32>
    %368 = arith.addf %362, %367 : vector<8x256xf32>
    %369 = vector.extract_strided_slice %0 {offsets = [0, 61], sizes = [8, 1], strides = [1, 1]} : vector<8x64xi32> to vector<8x1xi32>
    %370 = vector.broadcast %369 : vector<8x1xi32> to vector<8x256xi32>
    %371 = arith.cmpi eq, %370, %1 : vector<8x256xi32>
    %372 = arith.extui %371 : vector<8x256xi1> to vector<8x256xi32>
    %373 = arith.sitofp %372 : vector<8x256xi32> to vector<8x256xf32>
    %374 = arith.addf %368, %373 : vector<8x256xf32>
    %375 = vector.extract_strided_slice %0 {offsets = [0, 62], sizes = [8, 1], strides = [1, 1]} : vector<8x64xi32> to vector<8x1xi32>
    %376 = vector.broadcast %375 : vector<8x1xi32> to vector<8x256xi32>
    %377 = arith.cmpi eq, %376, %1 : vector<8x256xi32>
    %378 = arith.extui %377 : vector<8x256xi1> to vector<8x256xi32>
    %379 = arith.sitofp %378 : vector<8x256xi32> to vector<8x256xf32>
    %380 = arith.addf %374, %379 : vector<8x256xf32>
    %381 = vector.extract_strided_slice %0 {offsets = [0, 63], sizes = [8, 1], strides = [1, 1]} : vector<8x64xi32> to vector<8x1xi32>
    %382 = vector.broadcast %381 : vector<8x1xi32> to vector<8x256xi32>
    %383 = arith.cmpi eq, %382, %1 : vector<8x256xi32>
    %384 = arith.extui %383 : vector<8x256xi1> to vector<8x256xi32>
    %385 = arith.sitofp %384 : vector<8x256xi32> to vector<8x256xf32>
    %386 = arith.addf %380, %385 : vector<8x256xf32>
    %c0_1 = arith.constant 0 : index
    %c0_2 = arith.constant 0 : index
    %387 = vector.load %arg2[%c0_1, %c0_2] : memref<256x128xf32, #tpu.memory_space<vmem>>, vector<256x128xf32>
    %cst_3 = arith.constant dense<0.000000e+00> : vector<8x128xf32>
    %388 = tpu.matmul %386, %387, %cst_3 {dimension_numbers = #tpu.dot_dimension_numbers<[1], [0], [0], [1], [0, 0, 1, 1], [], []>} : vector<8x256xf32>, vector<256x128xf32>, vector<8x128xf32> -> vector<8x128xf32>
    %c0_4 = arith.constant 0 : index
    %c0_5 = arith.constant 0 : index
    %389 = vector.load %arg3[%c0_4, %c0_5] : memref<8x128xf32, #tpu.memory_space<vmem>>, vector<8x128xf32>
    tpu.vector_store %arg3[%c0_4, %c0_5], %388 {strides = array<i32>} : memref<8x128xf32, #tpu.memory_space<vmem>>, vector<8x128xf32>,
    return
  }
  func.func @transform_0(%arg0: i32) -> (i32, i32) {
    %c0_i32 = arith.constant 0 : i32
    %c0_i32_0 = arith.constant 0 : i32
    return %arg0, %c0_i32 : i32, i32
  }
  func.func @transform_1(%arg0: i32) -> (i32, i32) {
    %c0_i32 = arith.constant 0 : i32
    %c0_i32_0 = arith.constant 0 : i32
    %c0_i32_1 = arith.constant 0 : i32
    return %c0_i32, %c0_i32_0 : i32, i32
  }
  func.func @transform_2(%arg0: i32) -> (i32, i32) {
    %c0_i32 = arith.constant 0 : i32
    %c0_i32_0 = arith.constant 0 : i32
    return %arg0, %c0_i32 : i32, i32
  }
}

</mosaic_0001>

<bundles_post_ra>
// kernel: bow_encoder_forward.1
= control target key start
LH: loop header
LB: loop body
LE: loop exit
PB: predicated region body
PF: predicated region fallthrough
CT: control target
= control target key end

     0   :  { %v1151_v0 = vmov 2   ;;  %v1152_v1 = vmov 0   ;;  %v1153_v3 = vmov 3   ;;  %v1154_v4 = vmov 1   ;;  %s1674_s0 = inlined_call_operand.vmem [shape: s32[8,64], index: 0, kind: input, shape index: {}]   ;;  %s1675_s1 = inlined_call_operand.vmem [shape: f32[256,128], index: 1, kind: input, shape index: {}]   ;;  %s1676_s2 = inlined_call_operand.vmem [shape: f32[8,128], index: 2, kind: output, shape index: {}]  }
   0x1   :  { %1088 = vset.pattern.permute.xlu1 %v1151_v0  ;;  %1086 = vset.pattern.permute.xlu0 %v1152_v1  ;;  %v1234_v2 = vld [vmem:[%s1674_s0] sm:$0xff]  ;;  %v1155_v5 = vmov 4   ;;  %v1156_v6 = vmov 5   ;;  %v1157_v7 = vmov 6   ;;  %v1158_v8 = vmov 8  }
   0x2   :  { %38 = vperm.xlu1 %1088, %v1234_v2   ;;  %16 = vperm.xlu0 %1086, %v1234_v2   ;;  %v1159_v9 = vmov 7   ;;  %v1160_v10 = vmov 11   ;;  %v1161_v11 = vmov 9   ;;  %v1162_v12 = vmov 14  }
   0x3   :  { %v1163_v13 = vmov 10   ;;  %v1164_v14 = vmov 17   ;;  %v1165_v15 = vmov 12   ;;  %v1166_v16 = vmov 20  }
   0x4   :  { %v1167_v17 = vmov 13   ;;  %v1168_v18 = vmov 23   ;;  %v1169_v19 = vmov 15   ;;  %v1170_v20 = vmov 26  }
   0x5   :  { %v1171_v21 = vmov 16   ;;  %v1172_v22 = vmov 29   ;;  %v1173_v23 = vmov 18   ;;  %v1174_v24 = vmov 32  }
   0x6   :  { %1089 = vset.pattern.permute.xlu1 %v1153_v3  ;;  %1087 = vset.pattern.permute.xlu0 %v1154_v4  ;;  %v1175_v25 = vmov 19   ;;  %v1176_v26 = vmov 35   ;;  %v1177_v27 = vmov 21   ;;  %v1178_v28 = vmov 38  }
   0x7   :  { %49 = vperm.xlu1 %1089, %v1234_v2   ;;  %27 = vperm.xlu0 %1087, %v1234_v2   ;;  %v1179_v29 = vmov 22   ;;  %v1180_v30 = vmov 41   ;;  %v1181_v31 = vmov 24   ;;  %v1182_v32 = vmov 44  }
   0x8   :  { %v1183_v33 = vmov 25   ;;  %v1184_v34 = vmov 47   ;;  %v1185_v35 = vmov 27   ;;  %v1186_v36 = vmov 50  }
   0x9   :  { %v1187_v37 = vmov 28   ;;  %v1188_v38 = vmov 53   ;;  %v1189_v39 = vmov 30   ;;  %v1190_v40 = vmov 56  }
   0xa   :  { %v1191_v41 = vmov 31   ;;  %v1192_v42 = vmov 59   ;;  %v1193_v43 = vmov 33   ;;  %v1194_v44 = vmov 62  }
   0xb   :  { %1090 = vset.pattern.permute.xlu1 %v1155_v5  ;;  %1091 = vset.pattern.permute.xlu0 %v1156_v6  ;;  %v1195_v45 = vmov 34   ;;  %v1196_v46 = vmov 63   ;;  %v1197_v47 = vmov 36   ;;  %v1198_v48 = vmov 37  }
   0xc   :  { %60 = vperm.xlu1 %1090, %v1234_v2   ;;  %71 = vperm.xlu0 %1091, %v1234_v2   ;;  %v12_v49 = vlaneseq  ;;  %v1199_v51 = vmov 39   ;;  %v1200_v55 = vmov 40   ;;  %v1201_v56 = vmov 0.0  }
   0xd   :  { %v1202_v63 = vmov 42  }
   0xe   :  { %v1284_v50 = vand.u32 127, %v12_v49 }
  0x10   :  { %1092 = vset.pattern.permute.xlu1 %v1157_v7  ;;  %1094 = vset.pattern.permute.xlu0 %v1158_v8  ;;  %v1288_v52 = vadd.s32 128, %v1284_v50 }
  0x11   :  { %82 = vperm.xlu1 %1092, %v1234_v2   ;;  %104 = vperm.xlu0 %1094, %v1234_v2  }
  0x15   :  { %1093 = vset.pattern.permute.xlu1 %v1159_v9  ;;  %1097 = vset.pattern.permute.xlu0 %v1160_v10 }
  0x16   :  { %93 = vperm.xlu1 %1093, %v1234_v2   ;;  %137 = vperm.xlu0 %1097, %v1234_v2  }
  0x1a   :  { %1095 = vset.pattern.permute.xlu1 %v1161_v11  ;;  %1100 = vset.pattern.permute.xlu0 %v1162_v12 }
  0x1b   :  { %115 = vperm.xlu1 %1095, %v1234_v2   ;;  %170 = vperm.xlu0 %1100, %v1234_v2  }
  0x1f   :  { %1096 = vset.pattern.permute.xlu1 %v1163_v13  ;;  %1103 = vset.pattern.permute.xlu0 %v1164_v14 }
  0x20   :  { %126 = vperm.xlu1 %1096, %v1234_v2   ;;  %203 = vperm.xlu0 %1103, %v1234_v2  }
  0x24   :  { %1098 = vset.pattern.permute.xlu1 %v1165_v15  ;;  %1106 = vset.pattern.permute.xlu0 %v1166_v16  ;;  %v1203_v15 = vmov 43  }
  0x25   :  { %148 = vperm.xlu1 %1098, %v1234_v2   ;;  %236 = vperm.xlu0 %1106, %v1234_v2  }
  0x29   :  { %1099 = vset.pattern.permute.xlu1 %v1167_v17  ;;  %1109 = vset.pattern.permute.xlu0 %v1168_v18 }
  0x2a   :  { %159 = vperm.xlu1 %1099, %v1234_v2   ;;  %269 = vperm.xlu0 %1109, %v1234_v2  }
  0x2e   :  { %1101 = vset.pattern.permute.xlu1 %v1169_v19  ;;  %1112 = vset.pattern.permute.xlu0 %v1170_v20 }
  0x2f   :  { %181 = vperm.xlu1 %1101, %v1234_v2   ;;  %302 = vperm.xlu0 %1112, %v1234_v2  }
  0x33   :  { %1102 = vset.pattern.permute.xlu1 %v1171_v21  ;;  %1115 = vset.pattern.permute.xlu0 %v1172_v22 }
  0x34   :  { %192 = vperm.xlu1 %1102, %v1234_v2   ;;  %335 = vperm.xlu0 %1115, %v1234_v2  }
  0x38   :  { %1104 = vset.pattern.permute.xlu1 %v1173_v23  ;;  %1118 = vset.pattern.permute.xlu0 %v1174_v24  ;;  %v1204_v23 = vmov 45  }
  0x39   :  { %214 = vperm.xlu1 %1104, %v1234_v2   ;;  %368 = vperm.xlu0 %1118, %v1234_v2  }
  0x3d   :  { %1105 = vset.pattern.permute.xlu1 %v1175_v25  ;;  %1121 = vset.pattern.permute.xlu0 %v1176_v26 }
  0x3e   :  { %225 = vperm.xlu1 %1105, %v1234_v2   ;;  %401 = vperm.xlu0 %1121, %v1234_v2  }
  0x42   :  { %1107 = vset.pattern.permute.xlu1 %v1177_v27  ;;  %1124 = vset.pattern.permute.xlu0 %v1178_v28 }
  0x43   :  { %247 = vperm.xlu1 %1107, %v1234_v2   ;;  %434 = vperm.xlu0 %1124, %v1234_v2  }
  0x47   :  { %1108 = vset.pattern.permute.xlu1 %v1179_v29  ;;  %1127 = vset.pattern.permute.xlu0 %v1180_v30 }
  0x48   :  { %258 = vperm.xlu1 %1108, %v1234_v2   ;;  %467 = vperm.xlu0 %1127, %v1234_v2  }
  0x4c   :  { %1110 = vset.pattern.permute.xlu1 %v1181_v31  ;;  %1130 = vset.pattern.permute.xlu0 %v1182_v32  ;;  %v1205_v32 = vmov 46  }
  0x4d   :  { %280 = vperm.xlu1 %1110, %v1234_v2   ;;  %500 = vperm.xlu0 %1130, %v1234_v2  }
  0x51   :  { %1111 = vset.pattern.permute.xlu1 %v1183_v33  ;;  %1133 = vset.pattern.permute.xlu0 %v1184_v34 }
  0x52   :  { %291 = vperm.xlu1 %1111, %v1234_v2   ;;  %533 = vperm.xlu0 %1133, %v1234_v2  }
  0x56   :  { %1113 = vset.pattern.permute.xlu1 %v1185_v35  ;;  %1136 = vset.pattern.permute.xlu0 %v1186_v36 }
  0x57   :  { %313 = vperm.xlu1 %1113, %v1234_v2   ;;  %566 = vperm.xlu0 %1136, %v1234_v2  }
  0x5b   :  { %1114 = vset.pattern.permute.xlu1 %v1187_v37  ;;  %1139 = vset.pattern.permute.xlu0 %v1188_v38 }
  0x5c   :  { %324 = vperm.xlu1 %1114, %v1234_v2   ;;  %599 = vperm.xlu0 %1139, %v1234_v2  }
  0x60   :  { %1116 = vset.pattern.permute.xlu1 %v1189_v39  ;;  %1142 = vset.pattern.permute.xlu0 %v1190_v40  ;;  %v1206_v40 = vmov 48  }
  0x61   :  { %346 = vperm.xlu1 %1116, %v1234_v2   ;;  %632 = vperm.xlu0 %1142, %v1234_v2  }
  0x65   :  { %1117 = vset.pattern.permute.xlu1 %v1191_v41  ;;  %1145 = vset.pattern.permute.xlu0 %v1192_v42 }
  0x66   :  { %357 = vperm.xlu1 %1117, %v1234_v2   ;;  %665 = vperm.xlu0 %1145, %v1234_v2  }
  0x6a   :  { %1119 = vset.pattern.permute.xlu1 %v1193_v43  ;;  %1148 = vset.pattern.permute.xlu0 %v1194_v44 }
  0x6b   :  { %379 = vperm.xlu1 %1119, %v1234_v2   ;;  %698 = vperm.xlu0 %1148, %v1234_v2  }
  0x6f   :  { %1120 = vset.pattern.permute.xlu1 %v1195_v45  ;;  %1150 = vset.pattern.permute.xlu0 %v1196_v46 }
  0x70   :  { %390 = vperm.xlu1 %1120, %v1234_v2  }
  0x74   :  { %1122 = vset.pattern.permute.xlu1 %v1197_v47 }
  0x75   :  { %412 = vperm.xlu1 %1122, %v1234_v2  }
  0x79   :  { %1123 = vset.pattern.permute.xlu1 %v1198_v48 }
  0x7a   :  { %423 = vperm.xlu1 %1123, %v1234_v2  }
  0x7e   :  { %1125 = vset.pattern.permute.xlu1 %v1199_v51  ;;  %v1207_v51 = vmov 49  }
  0x7f   :  { %445 = vperm.xlu1 %1125, %v1234_v2  }
  0x81   :  { %v39_v53 = vpop.permute.xlu1 %38  ;;  %v17_v54 = vpop.permute.xlu0 %16 }
  0x82   :  { %vm18_vm0 = vcmp.eq.s32.totalorder %v17_v54, %v1284_v50  ;;  %vm19_vm1 = vcmp.eq.s32.totalorder %v17_v54, %v1288_v52  ;;  %vm40_vm2 = vcmp.eq.s32.totalorder %v39_v53, %v1284_v50  ;;  %vm41_vm3 = vcmp.eq.s32.totalorder %v39_v53, %v1288_v52 }
  0x83   :  { %1126 = vset.pattern.permute.xlu1 %v1200_v55  ;;  %v826_v57 = vsel %vm18_vm0, 1.0, %v1201_v56  ;;  %v827_v58 = vsel %vm19_vm1, 1.0, %v1201_v56  ;;  %v830_v3 = vsel %vm40_vm2, 1.0, %v1201_v56  ;;  %v831_v4 = vsel %vm41_vm3, 1.0, %v1201_v56 }
  0x84   :  { %456 = vperm.xlu1 %1126, %v1234_v2  }
  0x86   :  { %v50_v59 = vpop.permute.xlu1 %49  ;;  %v28_v60 = vpop.permute.xlu0 %27 }
  0x87   :  { %vm29_vm4 = vcmp.eq.s32.totalorder %v28_v60, %v1284_v50  ;;  %vm30_vm5 = vcmp.eq.s32.totalorder %v28_v60, %v1288_v52  ;;  %vm51_vm6 = vcmp.eq.s32.totalorder %v50_v59, %v1284_v50  ;;  %vm52_vm7 = vcmp.eq.s32.totalorder %v50_v59, %v1288_v52 }
  0x88   :  { %v828_v61 = vsel %vm29_vm4, 1.0, %v1201_v56  ;;  %v829_v62 = vsel %vm30_vm5, 1.0, %v1201_v56  ;;  %1128 = vset.pattern.permute.xlu1 %v1202_v63  ;;  %v832_v5 = vsel %vm51_vm6, 1.0, %v1201_v56  ;;  %v833_v6 = vsel %vm52_vm7, 1.0, %v1201_v56 }
  0x89   :  { %v35_v0 = vadd.f32 %v828_v61, %v826_v57  ;;  %v36_v1 = vadd.f32 %v829_v62, %v827_v58  ;;  %478 = vperm.xlu1 %1128, %v1234_v2   ;;  %v1208_v61 = vmov 51  }
  0x8b   :  { %v46_v7 = vadd.f32 %v830_v3, %v35_v0  ;;  %v47_v8 = vadd.f32 %v831_v4, %v36_v1  ;;  %v61_v9 = vpop.permute.xlu1 %60  ;;  %v72_v10 = vpop.permute.xlu0 %71 }
  0x8c   :  { %vm62_vm8 = vcmp.eq.s32.totalorder %v61_v9, %v1284_v50  ;;  %vm63_vm9 = vcmp.eq.s32.totalorder %v61_v9, %v1288_v52  ;;  %vm73_vm10 = vcmp.eq.s32.totalorder %v72_v10, %v1284_v50  ;;  %vm74_vm11 = vcmp.eq.s32.totalorder %v72_v10, %v1288_v52 }
  0x8d   :  { %v57_v11 = vadd.f32 %v832_v5, %v46_v7  ;;  %v58_v12 = vadd.f32 %v833_v6, %v47_v8  ;;  %v834_v13 = vsel %vm62_vm8, 1.0, %v1201_v56  ;;  %v835_v14 = vsel %vm63_vm9, 1.0, %v1201_v56  ;;  %1129 = vset.pattern.permute.xlu1 %v1203_v15 }
  0x8e   :  { %489 = vperm.xlu1 %1129, %v1234_v2   ;;  %v836_v18 = vsel %vm73_vm10, 1.0, %v1201_v56  ;;  %v837_v19 = vsel %vm74_vm11, 1.0, %v1201_v56  ;;  %v1209_v7 = vmov 52   ;;  %v1210_v15 = vmov 54  }
  0x8f   :  { %v68_v16 = vadd.f32 %v834_v13, %v57_v11  ;;  %v69_v17 = vadd.f32 %v835_v14, %v58_v12 }
  0x90   :  { %v83_v20 = vpop.permute.xlu1 %82  ;;  %v105_v24 = vpop.permute.xlu0 %104 }
  0x91   :  { %vm84_vm12 = vcmp.eq.s32.totalorder %v83_v20, %v1284_v50  ;;  %vm85_vm13 = vcmp.eq.s32.totalorder %v83_v20, %v1288_v52  ;;  %v79_v21 = vadd.f32 %v836_v18, %v68_v16  ;;  %v80_v22 = vadd.f32 %v837_v19, %v69_v17  ;;  %v735_v19 = vld [vmem:[%s1675_s1 + $0x80] sm:$0xff]  ;;  %v736_v20 = vld [vmem:[%s1675_s1 + $0x88] sm:$0xff] }
  0x92   :  { %1131 = vset.pattern.permute.xlu1 %v1204_v23  ;;  %v838_v25 = vsel %vm84_vm12, 1.0, %v1201_v56  ;;  %v839_v26 = vsel %vm85_vm13, 1.0, %v1201_v56  ;;  %vm106_vm14 = vcmp.eq.s32.totalorder %v105_v24, %v1284_v50  ;;  %vm107_vm15 = vcmp.eq.s32.totalorder %v105_v24, %v1288_v52  ;;  %v720_v23 = vld [vmem:[%s1675_s1 + $0x8] sm:$0xff] }
  0x93   :  { %511 = vperm.xlu1 %1131, %v1234_v2   ;;  %v90_v28 = vadd.f32 %v838_v25, %v79_v21  ;;  %v91_v29 = vadd.f32 %v839_v26, %v80_v22  ;;  %v842_v35 = vsel %vm106_vm14, 1.0, %v1201_v56  ;;  %v843_v36 = vsel %vm107_vm15, 1.0, %v1201_v56  ;;  %v719_v22 = vld [vmem:[%s1675_s1] sm:$0xff] }
  0x94   :  { %v989_v21 = vpack.c.bf16 %v736_v20, %v735_v19  ;;  %v991_v25 = vpack.c.bf16 %v720_v23, %v719_v22  ;;  %v1214_v19 = vmov 60  }
  0x95   :  { %v94_v27 = vpop.permute.xlu1 %93  ;;  %v138_v41 = vpop.permute.xlu0 %137 }
  0x96   :  { %vm95_vm0 = vcmp.eq.s32.totalorder %v94_v27, %v1284_v50  ;;  %vm96_vm1 = vcmp.eq.s32.totalorder %v94_v27, %v1288_v52  ;;  %vm139_vm4 = vcmp.eq.s32.totalorder %v138_v41, %v1284_v50  ;;  %vm140_vm5 = vcmp.eq.s32.totalorder %v138_v41, %v1288_v52  ;;  %990 = vmatprep.subr.bf16.mxu0 %v989_v21 }
  0x97   :  { %v840_v30 = vsel %vm95_vm0, 1.0, %v1201_v56  ;;  %v841_v31 = vsel %vm96_vm1, 1.0, %v1201_v56  ;;  %1132 = vset.pattern.permute.xlu1 %v1205_v32  ;;  %v848_v55 = vsel %vm139_vm4, 1.0, %v1201_v56  ;;  %v849_v57 = vsel %vm140_vm5, 1.0, %v1201_v56  ;;  %992 = vmatpush3.bf16.msra.mxu0 %v991_v25  ;;  %v738_v32 = vld [vmem:[%s1675_s1 + $0x98] sm:$0xff] }
  0x98   :  { %v101_v33 = vadd.f32 %v840_v30, %v90_v28  ;;  %v102_v34 = vadd.f32 %v841_v31, %v91_v29  ;;  %522 = vperm.xlu1 %1132, %v1234_v2   ;;  %v1211_v30 = vmov 55   ;;  %v737_v31 = vld [vmem:[%s1675_s1 + $0x90] sm:$0xff]  ;;  %v746_v25 = vld [vmem:[%s1675_s1 + $0xd8] sm:$0xff] }
  0x9a   :  { %v116_v37 = vpop.permute.xlu1 %115  ;;  %v112_v38 = vadd.f32 %v842_v35, %v101_v33  ;;  %v113_v39 = vadd.f32 %v843_v36, %v102_v34  ;;  %v171_v62 = vpop.permute.xlu0 %170  ;;  %v993_v35 = vpack.c.bf16 %v738_v32, %v737_v31  ;;  %v721_v36 = vld [vmem:[%s1675_s1 + $0x10] sm:$0xff] }
  0x9b   :  { %vm117_vm2 = vcmp.eq.s32.totalorder %v116_v37, %v1284_v50  ;;  %vm118_vm3 = vcmp.eq.s32.totalorder %v116_v37, %v1288_v52  ;;  %vm172_vm10 = vcmp.eq.s32.totalorder %v171_v62, %v1284_v50  ;;  %vm173_vm11 = vcmp.eq.s32.totalorder %v171_v62, %v1288_v52  ;;  %v722_v37 = vld [vmem:[%s1675_s1 + $0x18] sm:$0xff] }
  0x9c   :  { %1134 = vset.pattern.permute.xlu1 %v1206_v40  ;;  %v844_v42 = vsel %vm117_vm2, 1.0, %v1201_v56  ;;  %v845_v43 = vsel %vm118_vm3, 1.0, %v1201_v56  ;;  %v854_v10 = vsel %vm172_vm10, 1.0, %v1201_v56  ;;  %v855_v11 = vsel %vm173_vm11, 1.0, %v1201_v56  ;;  %994 = vmatprep.subr.bf16.mxu0 %v993_v35 }
  0x9d   :  { %544 = vperm.xlu1 %1134, %v1234_v2   ;;  %v123_v45 = vadd.f32 %v844_v42, %v112_v38  ;;  %v124_v47 = vadd.f32 %v845_v43, %v113_v39  ;;  %v995_v40 = vpack.c.bf16 %v722_v37, %v721_v36  ;;  %v739_v42 = vld [vmem:[%s1675_s1 + $0xa0] sm:$0xff]  ;;  %v740_v43 = vld [vmem:[%s1675_s1 + $0xa8] sm:$0xff]  ;;  %v1215_v35 = vmov 61  }
  0x9e   :  { %v747_v36 = vld [vmem:[%s1675_s1 + $0xe0] sm:$0xff]  ;;  %v748_v37 = vld [vmem:[%s1675_s1 + $0xe8] sm:$0xff] }
  0x9f   :  { %v127_v44 = vpop.permute.xlu1 %126  ;;  %v204_v16 = vpop.permute.xlu0 %203  ;;  %996 = vmatpush3.bf16.msra.mxu0 %v995_v40  ;;  %v1013_v40 = vpack.c.bf16 %v748_v37, %v747_v36 }
  0xa0   :  { %vm128_vm6 = vcmp.eq.s32.totalorder %v127_v44, %v1284_v50  ;;  %vm129_vm7 = vcmp.eq.s32.totalorder %v127_v44, %v1288_v52  ;;  %vm205_vm0 = vcmp.eq.s32.totalorder %v204_v16, %v1284_v50  ;;  %vm206_vm1 = vcmp.eq.s32.totalorder %v204_v16, %v1288_v52  ;;  %v728_v16 = vld [vmem:[%s1675_s1 + $0x48] sm:$0xff] }
  0xa1   :  { %v846_v48 = vsel %vm128_vm6, 1.0, %v1201_v56  ;;  %v847_v49 = vsel %vm129_vm7, 1.0, %v1201_v56  ;;  %1135 = vset.pattern.permute.xlu1 %v1207_v51  ;;  %v860_v38 = vsel %vm205_vm0, 1.0, %v1201_v56  ;;  %v861_v39 = vsel %vm206_vm1, 1.0, %v1201_v56  ;;  %v724_v51 = vld [vmem:[%s1675_s1 + $0x28] sm:$0xff] }
  0xa2   :  { %v134_v53 = vadd.f32 %v846_v48, %v123_v45  ;;  %v135_v54 = vadd.f32 %v847_v49, %v124_v47  ;;  %555 = vperm.xlu1 %1135, %v1234_v2   ;;  %v1212_v47 = vmov 57   ;;  %v723_v49 = vld [vmem:[%s1675_s1 + $0x20] sm:$0xff] }
  0xa4   :  { %v149_v58 = vpop.permute.xlu1 %148  ;;  %v145_v59 = vadd.f32 %v848_v55, %v134_v53  ;;  %v146_v60 = vadd.f32 %v849_v57, %v135_v54  ;;  %v237_v48 = vpop.permute.xlu0 %236  ;;  %v997_v55 = vpack.c.bf16 %v740_v43, %v739_v42  ;;  %v999_v57 = vpack.c.bf16 %v724_v51, %v723_v49  ;;  %v732_v42 = vld [vmem:[%s1675_s1 + $0x68] sm:$0xff]  ;;  %v750_v49 = vld [vmem:[%s1675_s1 + $0xf8] sm:$0xff] }
  0xa5   :  { %vm150_vm8 = vcmp.eq.s32.totalorder %v149_v58, %v1284_v50  ;;  %vm151_vm9 = vcmp.eq.s32.totalorder %v149_v58, %v1288_v52  ;;  %vm238_vm6 = vcmp.eq.s32.totalorder %v237_v48, %v1284_v50  ;;  %vm239_vm7 = vcmp.eq.s32.totalorder %v237_v48, %v1288_v52  ;;  %v749_v48 = vld [vmem:[%s1675_s1 + $0xf0] sm:$0xff] }
  0xa6   :  { %1137 = vset.pattern.permute.xlu1 %v1208_v61  ;;  %v850_v63 = vsel %vm150_vm8, 1.0, %v1201_v56  ;;  %v851_v0 = vsel %vm151_vm9, 1.0, %v1201_v56  ;;  %998 = vmatprep.subr.bf16.mxu0 %v997_v55  ;;  %v733_v55 = vld [vmem:[%s1675_s1 + $0x70] sm:$0xff] }
  0xa7   :  { %577 = vperm.xlu1 %1137, %v1234_v2   ;;  %v156_v3 = vadd.f32 %v850_v63, %v145_v59  ;;  %v157_v4 = vadd.f32 %v851_v0, %v146_v60  ;;  %v741_v59 = vld [vmem:[%s1675_s1 + $0xb0] sm:$0xff]  ;;  %v742_v60 = vld [vmem:[%s1675_s1 + $0xb8] sm:$0xff]  ;;  %1000 = vmatpush3.bf16.msra.mxu0 %v999_v57 }
  0xa8   :  { %v725_v63 = vld [vmem:[%s1675_s1 + $0x30] sm:$0xff]  ;;  %v726_v0 = vld [vmem:[%s1675_s1 + $0x38] sm:$0xff] }
  0xa9   :  { %v160_v1 = vpop.permute.xlu1 %159  ;;  %v270_v20 = vpop.permute.xlu0 %269  ;;  %v734_v57 = vld [vmem:[%s1675_s1 + $0x78] sm:$0xff] }
  0xaa   :  { %vm161_vm12 = vcmp.eq.s32.totalorder %v160_v1, %v1284_v50  ;;  %vm162_vm13 = vcmp.eq.s32.totalorder %v160_v1, %v1288_v52 }
  0xab   :  { %v852_v5 = vsel %vm161_vm12, 1.0, %v1201_v56  ;;  %v853_v6 = vsel %vm162_vm13, 1.0, %v1201_v56  ;;  %1138 = vset.pattern.permute.xlu1 %v1209_v7  ;;  %v1001_v7 = vpack.c.bf16 %v742_v60, %v741_v59  ;;  %vm271_vm12 = vcmp.eq.s32.totalorder %v270_v20, %v1284_v50 }
  0xac   :  { %v167_v8 = vadd.f32 %v852_v5, %v156_v3  ;;  %v168_v9 = vadd.f32 %v853_v6, %v157_v4  ;;  %588 = vperm.xlu1 %1138, %v1234_v2   ;;  %v1213_v4 = vmov 58   ;;  %vm272_vm13 = vcmp.eq.s32.totalorder %v270_v20, %v1288_v52 }
  0xad   :  { %1002 = vmatprep.subr.bf16.mxu0 %v1001_v7  ;;  %v872_v43 = vsel %vm271_vm12, 1.0, %v1201_v56  ;;  %v1017_v60 = vpack.c.bf16 %v750_v49, %v749_v48 }
  0xae   :  { %v182_v12 = vpop.permute.xlu1 %181  ;;  %v178_v13 = vadd.f32 %v854_v10, %v167_v8  ;;  %v179_v14 = vadd.f32 %v855_v11, %v168_v9  ;;  %v1003_v8 = vpack.c.bf16 %v726_v0, %v725_v63  ;;  %v866_v9 = vsel %vm238_vm6, 1.0, %v1201_v56  ;;  %v743_v11 = vld [vmem:[%s1675_s1 + $0xc0] sm:$0xff] }
  0xaf   :  { %vm183_vm14 = vcmp.eq.s32.totalorder %v182_v12, %v1284_v50  ;;  %vm184_vm15 = vcmp.eq.s32.totalorder %v182_v12, %v1288_v52  ;;  %v867_v10 = vsel %vm239_vm7, 1.0, %v1201_v56  ;;  %v744_v12 = vld [vmem:[%s1675_s1 + $0xc8] sm:$0xff] }
  0xb0   :  { %1140 = vset.pattern.permute.xlu1 %v1210_v15  ;;  %v856_v17 = vsel %vm183_vm14, 1.0, %v1201_v56  ;;  %v857_v18 = vsel %vm184_vm15, 1.0, %v1201_v56  ;;  %v727_v15 = vld [vmem:[%s1675_s1 + $0x40] sm:$0xff]  ;;  %1004 = vmatpush3.bf16.msra.mxu0 %v1003_v8 }
  0xb1   :  { %610 = vperm.xlu1 %1140, %v1234_v2   ;;  %v189_v26 = vadd.f32 %v856_v17, %v178_v13  ;;  %v190_v27 = vadd.f32 %v857_v18, %v179_v14  ;;  %v1005_v14 = vpack.c.bf16 %v744_v12, %v743_v11  ;;  %v1007_v23 = vpack.c.bf16 %v728_v16, %v727_v15 }
  0xb3   :  { %v193_v24 = vpop.permute.xlu1 %192  ;;  %1006 = vmatprep.subr.bf16.mxu0 %v1005_v14 }
  0xb4   :  { %vm194_vm2 = vcmp.eq.s32.totalorder %v193_v24, %v1284_v50  ;;  %vm195_vm3 = vcmp.eq.s32.totalorder %v193_v24, %v1288_v52  ;;  %v745_v24 = vld [vmem:[%s1675_s1 + $0xd0] sm:$0xff]  ;;  %1008 = vmatpush3.bf16.msra.mxu0 %v1007_v23 }
  0xb5   :  { %v858_v28 = vsel %vm194_vm2, 1.0, %v1201_v56  ;;  %v859_v29 = vsel %vm195_vm3, 1.0, %v1201_v56  ;;  %1141 = vset.pattern.permute.xlu1 %v1211_v30 }
  0xb6   :  { %v200_v33 = vadd.f32 %v858_v28, %v189_v26  ;;  %v201_v34 = vadd.f32 %v859_v29, %v190_v27  ;;  %621 = vperm.xlu1 %1141, %v1234_v2   ;;  %v1009_v26 = vpack.c.bf16 %v746_v25, %v745_v24  ;;  %v729_v27 = vld [vmem:[%s1675_s1 + $0x50] sm:$0xff]  ;;  %v730_v28 = vld [vmem:[%s1675_s1 + $0x58] sm:$0xff] }
  0xb7   :  { %v1011_v30 = vpack.c.bf16 %v730_v28, %v729_v27 }
  0xb8   :  { %v215_v41 = vpop.permute.xlu1 %214  ;;  %v211_v44 = vadd.f32 %v860_v38, %v200_v33  ;;  %v212_v45 = vadd.f32 %v861_v39, %v201_v34  ;;  %1010 = vmatprep.subr.bf16.mxu0 %v1009_v26 }
  0xb9   :  { %vm216_vm4 = vcmp.eq.s32.totalorder %v215_v41, %v1284_v50  ;;  %vm217_vm5 = vcmp.eq.s32.totalorder %v215_v41, %v1288_v52  ;;  %v731_v41 = vld [vmem:[%s1675_s1 + $0x60] sm:$0xff]  ;;  %1012 = vmatpush3.bf16.msra.mxu0 %v1011_v30 }
  0xba   :  { %1143 = vset.pattern.permute.xlu1 %v1212_v47  ;;  %v862_v53 = vsel %vm216_vm4, 1.0, %v1201_v56  ;;  %v863_v54 = vsel %vm217_vm5, 1.0, %v1201_v56  ;;  %1014 = vmatprep.subr.bf16.mxu0 %v1013_v40 }
  0xbb   :  { %643 = vperm.xlu1 %1143, %v1234_v2   ;;  %v222_v61 = vadd.f32 %v862_v53, %v211_v44  ;;  %v223_v62 = vadd.f32 %v863_v54, %v212_v45  ;;  %v873_v44 = vsel %vm272_vm13, 1.0, %v1201_v56  ;;  %v1015_v45 = vpack.c.bf16 %v732_v42, %v731_v41  ;;  %v303_v54 = vpop.permute.xlu0 %302 }
  0xbc   :  { %vm304_vm2 = vcmp.eq.s32.totalorder %v303_v54, %v1284_v50  ;;  %vm305_vm3 = vcmp.eq.s32.totalorder %v303_v54, %v1288_v52 }
  0xbd   :  { %v226_v58 = vpop.permute.xlu1 %225  ;;  %1016 = vmatpush3.bf16.msra.mxu0 %v1015_v45 }
  0xbe   :  { %vm227_vm8 = vcmp.eq.s32.totalorder %v226_v58, %v1284_v50  ;;  %vm228_vm9 = vcmp.eq.s32.totalorder %v226_v58, %v1288_v52  ;;  %1018 = vmatprep.subr.bf16.mxu0 %v1017_v60 }
  0xbf   :  { %v864_v1 = vsel %vm227_vm8, 1.0, %v1201_v56  ;;  %v865_v3 = vsel %vm228_vm9, 1.0, %v1201_v56  ;;  %1144 = vset.pattern.permute.xlu1 %v1213_v4  ;;  %v878_v4 = vsel %vm304_vm2, 1.0, %v1201_v56 }
  0xc0   :  { %v233_v5 = vadd.f32 %v864_v1, %v222_v61  ;;  %v234_v6 = vadd.f32 %v865_v3, %v223_v62  ;;  %654 = vperm.xlu1 %1144, %v1234_v2   ;;  %v1019_v61 = vpack.c.bf16 %v734_v57, %v733_v55 }
  0xc2   :  { %v248_v13 = vpop.permute.xlu1 %247  ;;  %v244_v17 = vadd.f32 %v866_v9, %v233_v5  ;;  %v245_v18 = vadd.f32 %v867_v10, %v234_v6  ;;  %1020 = vmatpush3.bf16.msra.mxu0 %v1019_v61  ;;  %v879_v5 = vsel %vm305_vm3, 1.0, %v1201_v56  ;;  %v336_v9 = vpop.permute.xlu0 %335 }
  0xc3   :  { %vm249_vm10 = vcmp.eq.s32.totalorder %v248_v13, %v1284_v50  ;;  %vm250_vm11 = vcmp.eq.s32.totalorder %v248_v13, %v1288_v52  ;;  %vm337_vm8 = vcmp.eq.s32.totalorder %v336_v9, %v1284_v50  ;;  %vm338_vm9 = vcmp.eq.s32.totalorder %v336_v9, %v1288_v52 }
  0xc4   :  { %1146 = vset.pattern.permute.xlu1 %v1214_v19  ;;  %v868_v21 = vsel %vm249_vm10, 1.0, %v1201_v56  ;;  %v869_v22 = vsel %vm250_vm11, 1.0, %v1201_v56  ;;  %v884_v19 = vsel %vm337_vm8, 1.0, %v1201_v56  ;;  %v885_v20 = vsel %vm338_vm9, 1.0, %v1201_v56 }
  0xc5   :  { %676 = vperm.xlu1 %1146, %v1234_v2   ;;  %v255_v31 = vadd.f32 %v868_v21, %v244_v17  ;;  %v256_v32 = vadd.f32 %v869_v22, %v245_v18 }
  0xc6   :  { %v369_v24 = vpop.permute.xlu0 %368 }
  0xc7   :  { %v259_v29 = vpop.permute.xlu1 %258 }
  0xc8   :  { %vm260_vm14 = vcmp.eq.s32.totalorder %v259_v29, %v1284_v50  ;;  %vm261_vm15 = vcmp.eq.s32.totalorder %v259_v29, %v1288_v52 }
  0xc9   :  { %v870_v33 = vsel %vm260_vm14, 1.0, %v1201_v56  ;;  %v871_v34 = vsel %vm261_vm15, 1.0, %v1201_v56  ;;  %1147 = vset.pattern.permute.xlu1 %v1215_v35  ;;  %vm370_vm14 = vcmp.eq.s32.totalorder %v369_v24, %v1284_v50  ;;  %vm371_vm15 = vcmp.eq.s32.totalorder %v369_v24, %v1288_v52 }
  0xca   :  { %v266_v38 = vadd.f32 %v870_v33, %v255_v31  ;;  %v267_v39 = vadd.f32 %v871_v34, %v256_v32  ;;  %687 = vperm.xlu1 %1147, %v1234_v2   ;;  %v890_v34 = vsel %vm370_vm14, 1.0, %v1201_v56  ;;  %v891_v35 = vsel %vm371_vm15, 1.0, %v1201_v56 }
  0xcc   :  { %v281_v47 = vpop.permute.xlu1 %280  ;;  %v277_v51 = vadd.f32 %v872_v43, %v266_v38  ;;  %v278_v53 = vadd.f32 %v873_v44, %v267_v39  ;;  %v402_v39 = vpop.permute.xlu0 %401 }
  0xcd   :  { %vm282_vm0 = vcmp.eq.s32.totalorder %v281_v47, %v1284_v50  ;;  %vm283_vm1 = vcmp.eq.s32.totalorder %v281_v47, %v1288_v52 }
  0xce   :  { %1149 = vset.pattern.permute.xlu1 %v1196_v46  ;;  %v874_v58 = vsel %vm282_vm0, 1.0, %v1201_v56  ;;  %v875_v59 = vsel %vm283_vm1, 1.0, %v1201_v56 }
  0xcf   :  { %709 = vperm.xlu1 %1149, %v1234_v2   ;;  %v288_v46 = vadd.f32 %v874_v58, %v277_v51  ;;  %v289_v63 = vadd.f32 %v875_v59, %v278_v53 }
  0xd0   :  { %v435_v58 = vpop.permute.xlu0 %434 }
  0xd1   :  { %v292_v62 = vpop.permute.xlu1 %291 }
  0xd2   :  { %vm293_vm4 = vcmp.eq.s32.totalorder %v292_v62, %v1284_v50  ;;  %vm294_vm5 = vcmp.eq.s32.totalorder %v292_v62, %v1288_v52 }
  0xd3   :  { %v876_v0 = vsel %vm293_vm4, 1.0, %v1201_v56  ;;  %v877_v1 = vsel %vm294_vm5, 1.0, %v1201_v56  ;;  %vm403_vm4 = vcmp.eq.s32.totalorder %v402_v39, %v1284_v50  ;;  %vm404_vm5 = vcmp.eq.s32.totalorder %v402_v39, %v1288_v52 }
  0xd4   :  { %v299_v2 = vadd.f32 %v876_v0, %v288_v46  ;;  %v300_v3 = vadd.f32 %v877_v1, %v289_v63  ;;  %v896_v51 = vsel %vm403_vm4, 1.0, %v1201_v56  ;;  %v897_v53 = vsel %vm404_vm5, 1.0, %v1201_v56 }
  0xd6   :  { %v314_v6 = vpop.permute.xlu1 %313  ;;  %v310_v7 = vadd.f32 %v878_v4, %v299_v2  ;;  %v311_v8 = vadd.f32 %v879_v5, %v300_v3 }
  0xd7   :  { %vm315_vm6 = vcmp.eq.s32.totalorder %v314_v6, %v1284_v50  ;;  %vm316_vm7 = vcmp.eq.s32.totalorder %v314_v6, %v1288_v52 }
  0xd8   :  { %v880_v10 = vsel %vm315_vm6, 1.0, %v1201_v56  ;;  %v881_v11 = vsel %vm316_vm7, 1.0, %v1201_v56 }
  0xd9   :  { %v321_v13 = vadd.f32 %v880_v10, %v310_v7  ;;  %v322_v14 = vadd.f32 %v881_v11, %v311_v8  ;;  %v468_v8 = vpop.permute.xlu0 %467 }
  0xdb   :  { %v325_v12 = vpop.permute.xlu1 %324 }
  0xdc   :  { %vm326_vm10 = vcmp.eq.s32.totalorder %v325_v12, %v1284_v50  ;;  %vm327_vm11 = vcmp.eq.s32.totalorder %v325_v12, %v1288_v52 }
  0xdd   :  { %v882_v15 = vsel %vm326_vm10, 1.0, %v1201_v56  ;;  %v883_v16 = vsel %vm327_vm11, 1.0, %v1201_v56  ;;  %vm436_vm10 = vcmp.eq.s32.totalorder %v435_v58, %v1284_v50  ;;  %vm437_vm11 = vcmp.eq.s32.totalorder %v435_v58, %v1288_v52 }
  0xde   :  { %v332_v17 = vadd.f32 %v882_v15, %v321_v13  ;;  %v333_v18 = vadd.f32 %v883_v16, %v322_v14  ;;  %v902_v3 = vsel %vm436_vm10, 1.0, %v1201_v56  ;;  %v903_v4 = vsel %vm437_vm11, 1.0, %v1201_v56 }
  0xe0   :  { %v347_v21 = vpop.permute.xlu1 %346  ;;  %v343_v22 = vadd.f32 %v884_v19, %v332_v17  ;;  %v344_v23 = vadd.f32 %v885_v20, %v333_v18 }
  0xe1   :  { %vm348_vm12 = vcmp.eq.s32.totalorder %v347_v21, %v1284_v50  ;;  %vm349_vm13 = vcmp.eq.s32.totalorder %v347_v21, %v1288_v52 }
  0xe2   :  { %v886_v25 = vsel %vm348_vm12, 1.0, %v1201_v56  ;;  %v887_v26 = vsel %vm349_vm13, 1.0, %v1201_v56 }
  0xe3   :  { %v354_v28 = vadd.f32 %v886_v25, %v343_v22  ;;  %v355_v29 = vadd.f32 %v887_v26, %v344_v23  ;;  %v501_v23 = vpop.permute.xlu0 %500 }
  0xe5   :  { %v358_v27 = vpop.permute.xlu1 %357 }
  0xe6   :  { %vm359_vm0 = vcmp.eq.s32.totalorder %v358_v27, %v1284_v50  ;;  %vm360_vm1 = vcmp.eq.s32.totalorder %v358_v27, %v1288_v52 }
  0xe7   :  { %v888_v30 = vsel %vm359_vm0, 1.0, %v1201_v56  ;;  %v889_v31 = vsel %vm360_vm1, 1.0, %v1201_v56  ;;  %vm469_vm0 = vcmp.eq.s32.totalorder %v468_v8, %v1284_v50  ;;  %vm470_vm1 = vcmp.eq.s32.totalorder %v468_v8, %v1288_v52 }
  0xe8   :  { %v365_v32 = vadd.f32 %v888_v30, %v354_v28  ;;  %v366_v33 = vadd.f32 %v889_v31, %v355_v29  ;;  %v908_v18 = vsel %vm469_vm0, 1.0, %v1201_v56  ;;  %v909_v19 = vsel %vm470_vm1, 1.0, %v1201_v56 }
  0xea   :  { %v380_v36 = vpop.permute.xlu1 %379  ;;  %v376_v37 = vadd.f32 %v890_v34, %v365_v32  ;;  %v377_v38 = vadd.f32 %v891_v35, %v366_v33 }
  0xeb   :  { %vm381_vm2 = vcmp.eq.s32.totalorder %v380_v36, %v1284_v50  ;;  %vm382_vm3 = vcmp.eq.s32.totalorder %v380_v36, %v1288_v52 }
  0xec   :  { %v892_v40 = vsel %vm381_vm2, 1.0, %v1201_v56  ;;  %v893_v41 = vsel %vm382_vm3, 1.0, %v1201_v56 }
  0xed   :  { %v387_v43 = vadd.f32 %v892_v40, %v376_v37  ;;  %v388_v44 = vadd.f32 %v893_v41, %v377_v38  ;;  %v534_v38 = vpop.permute.xlu0 %533 }
  0xef   :  { %v391_v42 = vpop.permute.xlu1 %390 }
  0xf0   :  { %vm392_vm6 = vcmp.eq.s32.totalorder %v391_v42, %v1284_v50  ;;  %vm393_vm7 = vcmp.eq.s32.totalorder %v391_v42, %v1288_v52 }
  0xf1   :  { %v894_v45 = vsel %vm392_vm6, 1.0, %v1201_v56  ;;  %v895_v47 = vsel %vm393_vm7, 1.0, %v1201_v56  ;;  %vm502_vm6 = vcmp.eq.s32.totalorder %v501_v23, %v1284_v50  ;;  %vm503_vm7 = vcmp.eq.s32.totalorder %v501_v23, %v1288_v52 }
  0xf2   :  { %v398_v48 = vadd.f32 %v894_v45, %v387_v43  ;;  %v399_v49 = vadd.f32 %v895_v47, %v388_v44  ;;  %v914_v33 = vsel %vm502_vm6, 1.0, %v1201_v56  ;;  %v915_v34 = vsel %vm503_vm7, 1.0, %v1201_v56 }
  0xf4   :  { %v413_v54 = vpop.permute.xlu1 %412  ;;  %v409_v55 = vadd.f32 %v896_v51, %v398_v48  ;;  %v410_v57 = vadd.f32 %v897_v53, %v399_v49 }
  0xf5   :  { %vm414_vm8 = vcmp.eq.s32.totalorder %v413_v54, %v1284_v50  ;;  %vm415_vm9 = vcmp.eq.s32.totalorder %v413_v54, %v1288_v52 }
  0xf6   :  { %v898_v59 = vsel %vm414_vm8, 1.0, %v1201_v56  ;;  %v899_v60 = vsel %vm415_vm9, 1.0, %v1201_v56 }
  0xf7   :  { %v420_v62 = vadd.f32 %v898_v59, %v409_v55  ;;  %v421_v46 = vadd.f32 %v899_v60, %v410_v57  ;;  %v567_v57 = vpop.permute.xlu0 %566 }
  0xf9   :  { %v424_v61 = vpop.permute.xlu1 %423 }
  0xfa   :  { %vm425_vm12 = vcmp.eq.s32.totalorder %v424_v61, %v1284_v50  ;;  %vm426_vm13 = vcmp.eq.s32.totalorder %v424_v61, %v1288_v52 }
  0xfb   :  { %v900_v63 = vsel %vm425_vm12, 1.0, %v1201_v56  ;;  %v901_v0 = vsel %vm426_vm13, 1.0, %v1201_v56  ;;  %vm535_vm12 = vcmp.eq.s32.totalorder %v534_v38, %v1284_v50  ;;  %vm536_vm13 = vcmp.eq.s32.totalorder %v534_v38, %v1288_v52 }
  0xfc   :  { %v431_v1 = vadd.f32 %v900_v63, %v420_v62  ;;  %v432_v2 = vadd.f32 %v901_v0, %v421_v46  ;;  %v920_v49 = vsel %vm535_vm12, 1.0, %v1201_v56  ;;  %v921_v51 = vsel %vm536_vm13, 1.0, %v1201_v56 }
  0xfe   :  { %v446_v5 = vpop.permute.xlu1 %445  ;;  %v442_v6 = vadd.f32 %v902_v3, %v431_v1  ;;  %v443_v7 = vadd.f32 %v903_v4, %v432_v2 }
  0xff   :  { %vm447_vm14 = vcmp.eq.s32.totalorder %v446_v5, %v1284_v50  ;;  %vm448_vm15 = vcmp.eq.s32.totalorder %v446_v5, %v1288_v52 }
 0x100   :  { %v904_v9 = vsel %vm447_vm14, 1.0, %v1201_v56  ;;  %v905_v10 = vsel %vm448_vm15, 1.0, %v1201_v56 }
 0x101   :  { %v453_v12 = vadd.f32 %v904_v9, %v442_v6  ;;  %v454_v13 = vadd.f32 %v905_v10, %v443_v7  ;;  %v600_v7 = vpop.permute.xlu0 %599 }
 0x103   :  { %v457_v11 = vpop.permute.xlu1 %456 }
 0x104   :  { %vm458_vm2 = vcmp.eq.s32.totalorder %v457_v11, %v1284_v50  ;;  %vm459_vm3 = vcmp.eq.s32.totalorder %v457_v11, %v1288_v52 }
 0x105   :  { %v906_v14 = vsel %vm458_vm2, 1.0, %v1201_v56  ;;  %v907_v15 = vsel %vm459_vm3, 1.0, %v1201_v56  ;;  %vm568_vm2 = vcmp.eq.s32.totalorder %v567_v57, %v1284_v50  ;;  %vm569_vm3 = vcmp.eq.s32.totalorder %v567_v57, %v1288_v52 }
 0x106   :  { %v464_v16 = vadd.f32 %v906_v14, %v453_v12  ;;  %v465_v17 = vadd.f32 %v907_v15, %v454_v13  ;;  %v926_v2 = vsel %vm568_vm2, 1.0, %v1201_v56  ;;  %v927_v3 = vsel %vm569_vm3, 1.0, %v1201_v56 }
 0x108   :  { %v479_v20 = vpop.permute.xlu1 %478  ;;  %v475_v21 = vadd.f32 %v908_v18, %v464_v16  ;;  %v476_v22 = vadd.f32 %v909_v19, %v465_v17 }
 0x109   :  { %vm480_vm4 = vcmp.eq.s32.totalorder %v479_v20, %v1284_v50  ;;  %vm481_vm5 = vcmp.eq.s32.totalorder %v479_v20, %v1288_v52 }
 0x10a   :  { %v910_v24 = vsel %vm480_vm4, 1.0, %v1201_v56  ;;  %v911_v25 = vsel %vm481_vm5, 1.0, %v1201_v56 }
 0x10b   :  { %v486_v27 = vadd.f32 %v910_v24, %v475_v21  ;;  %v487_v28 = vadd.f32 %v911_v25, %v476_v22  ;;  %v633_v22 = vpop.permute.xlu0 %632 }
 0x10d   :  { %v490_v26 = vpop.permute.xlu1 %489 }
 0x10e   :  { %vm491_vm8 = vcmp.eq.s32.totalorder %v490_v26, %v1284_v50  ;;  %vm492_vm9 = vcmp.eq.s32.totalorder %v490_v26, %v1288_v52 }
 0x10f   :  { %v912_v29 = vsel %vm491_vm8, 1.0, %v1201_v56  ;;  %v913_v30 = vsel %vm492_vm9, 1.0, %v1201_v56  ;;  %vm601_vm8 = vcmp.eq.s32.totalorder %v600_v7, %v1284_v50  ;;  %vm602_vm9 = vcmp.eq.s32.totalorder %v600_v7, %v1288_v52 }
 0x110   :  { %v497_v31 = vadd.f32 %v912_v29, %v486_v27  ;;  %v498_v32 = vadd.f32 %v913_v30, %v487_v28  ;;  %v932_v17 = vsel %vm601_vm8, 1.0, %v1201_v56  ;;  %v933_v18 = vsel %vm602_vm9, 1.0, %v1201_v56 }
 0x112   :  { %v512_v35 = vpop.permute.xlu1 %511  ;;  %v508_v36 = vadd.f32 %v914_v33, %v497_v31  ;;  %v509_v37 = vadd.f32 %v915_v34, %v498_v32 }
 0x113   :  { %vm513_vm10 = vcmp.eq.s32.totalorder %v512_v35, %v1284_v50  ;;  %vm514_vm11 = vcmp.eq.s32.totalorder %v512_v35, %v1288_v52 }
 0x114   :  { %v916_v39 = vsel %vm513_vm10, 1.0, %v1201_v56  ;;  %v917_v40 = vsel %vm514_vm11, 1.0, %v1201_v56 }
 0x115   :  { %v519_v42 = vadd.f32 %v916_v39, %v508_v36  ;;  %v520_v43 = vadd.f32 %v917_v40, %v509_v37  ;;  %v666_v37 = vpop.permute.xlu0 %665 }
 0x117   :  { %v523_v41 = vpop.permute.xlu1 %522 }
 0x118   :  { %vm524_vm14 = vcmp.eq.s32.totalorder %v523_v41, %v1284_v50  ;;  %vm525_vm15 = vcmp.eq.s32.totalorder %v523_v41, %v1288_v52 }
 0x119   :  { %v918_v44 = vsel %vm524_vm14, 1.0, %v1201_v56  ;;  %v919_v45 = vsel %vm525_vm15, 1.0, %v1201_v56  ;;  %vm634_vm14 = vcmp.eq.s32.totalorder %v633_v22, %v1284_v50  ;;  %vm635_vm15 = vcmp.eq.s32.totalorder %v633_v22, %v1288_v52 }
 0x11a   :  { %v530_v47 = vadd.f32 %v918_v44, %v519_v42  ;;  %v531_v48 = vadd.f32 %v919_v45, %v520_v43  ;;  %v938_v32 = vsel %vm634_vm14, 1.0, %v1201_v56  ;;  %v939_v33 = vsel %vm635_vm15, 1.0, %v1201_v56 }
 0x11c   :  { %v545_v53 = vpop.permute.xlu1 %544  ;;  %v541_v54 = vadd.f32 %v920_v49, %v530_v47  ;;  %v542_v55 = vadd.f32 %v921_v51, %v531_v48 }
 0x11d   :  { %vm546_vm0 = vcmp.eq.s32.totalorder %v545_v53, %v1284_v50  ;;  %vm547_vm1 = vcmp.eq.s32.totalorder %v545_v53, %v1288_v52  ;;  %v699_v53 = vpop.permute.xlu0 %698 }
 0x11e   :  { %v922_v58 = vsel %vm546_vm0, 1.0, %v1201_v56  ;;  %v923_v59 = vsel %vm547_vm1, 1.0, %v1201_v56 }
 0x11f   :  { %v552_v61 = vadd.f32 %v922_v58, %v541_v54  ;;  %v553_v62 = vadd.f32 %v923_v59, %v542_v55 }
 0x121   :  { %v556_v60 = vpop.permute.xlu1 %555 }
 0x122   :  { %vm557_vm4 = vcmp.eq.s32.totalorder %v556_v60, %v1284_v50  ;;  %vm558_vm5 = vcmp.eq.s32.totalorder %v556_v60, %v1288_v52 }
 0x123   :  { %v924_v46 = vsel %vm557_vm4, 1.0, %v1201_v56  ;;  %v925_v63 = vsel %vm558_vm5, 1.0, %v1201_v56  ;;  %vm667_vm4 = vcmp.eq.s32.totalorder %v666_v37, %v1284_v50  ;;  %vm668_vm5 = vcmp.eq.s32.totalorder %v666_v37, %v1288_v52 }
 0x124   :  { %v563_v0 = vadd.f32 %v924_v46, %v552_v61  ;;  %v564_v1 = vadd.f32 %v925_v63, %v553_v62  ;;  %v944_v48 = vsel %vm667_vm4, 1.0, %v1201_v56  ;;  %v945_v49 = vsel %vm668_vm5, 1.0, %v1201_v56 }
 0x126   :  { %v578_v4 = vpop.permute.xlu1 %577  ;;  %v574_v5 = vadd.f32 %v926_v2, %v563_v0  ;;  %v575_v6 = vadd.f32 %v927_v3, %v564_v1 }
 0x127   :  { %vm579_vm6 = vcmp.eq.s32.totalorder %v578_v4, %v1284_v50  ;;  %vm580_vm7 = vcmp.eq.s32.totalorder %v578_v4, %v1288_v52 }
 0x128   :  { %v928_v8 = vsel %vm579_vm6, 1.0, %v1201_v56  ;;  %v929_v9 = vsel %vm580_vm7, 1.0, %v1201_v56 }
 0x129   :  { %v585_v11 = vadd.f32 %v928_v8, %v574_v5  ;;  %v586_v12 = vadd.f32 %v929_v9, %v575_v6 }
 0x12b   :  { %v589_v10 = vpop.permute.xlu1 %588 }
 0x12c   :  { %vm590_vm10 = vcmp.eq.s32.totalorder %v589_v10, %v1284_v50  ;;  %vm591_vm11 = vcmp.eq.s32.totalorder %v589_v10, %v1288_v52 }
 0x12d   :  { %v930_v13 = vsel %vm590_vm10, 1.0, %v1201_v56  ;;  %v931_v14 = vsel %vm591_vm11, 1.0, %v1201_v56  ;;  %vm700_vm10 = vcmp.eq.s32.totalorder %v699_v53, %v1284_v50  ;;  %vm701_vm11 = vcmp.eq.s32.totalorder %v699_v53, %v1288_v52 }
 0x12e   :  { %v596_v15 = vadd.f32 %v930_v13, %v585_v11  ;;  %v597_v16 = vadd.f32 %v931_v14, %v586_v12  ;;  %v950_v63 = vsel %vm700_vm10, 1.0, %v1201_v56  ;;  %v951_v0 = vsel %vm701_vm11, 1.0, %v1201_v56 }
 0x130   :  { %v611_v19 = vpop.permute.xlu1 %610  ;;  %v607_v20 = vadd.f32 %v932_v17, %v596_v15  ;;  %v608_v21 = vadd.f32 %v933_v18, %v597_v16 }
 0x131   :  { %vm612_vm12 = vcmp.eq.s32.totalorder %v611_v19, %v1284_v50  ;;  %vm613_vm13 = vcmp.eq.s32.totalorder %v611_v19, %v1288_v52 }
 0x132   :  { %v934_v23 = vsel %vm612_vm12, 1.0, %v1201_v56  ;;  %v935_v24 = vsel %vm613_vm13, 1.0, %v1201_v56 }
 0x133   :  { %v618_v26 = vadd.f32 %v934_v23, %v607_v20  ;;  %v619_v27 = vadd.f32 %v935_v24, %v608_v21 }
 0x135   :  { %v622_v25 = vpop.permute.xlu1 %621 }
 0x136   :  { %vm623_vm0 = vcmp.eq.s32.totalorder %v622_v25, %v1284_v50  ;;  %vm624_vm1 = vcmp.eq.s32.totalorder %v622_v25, %v1288_v52 }
 0x137   :  { %v936_v28 = vsel %vm623_vm0, 1.0, %v1201_v56  ;;  %v937_v29 = vsel %vm624_vm1, 1.0, %v1201_v56 }
 0x138   :  { %v629_v30 = vadd.f32 %v936_v28, %v618_v26  ;;  %v630_v31 = vadd.f32 %v937_v29, %v619_v27 }
 0x13a   :  { %v644_v34 = vpop.permute.xlu1 %643  ;;  %v640_v35 = vadd.f32 %v938_v32, %v629_v30  ;;  %v641_v36 = vadd.f32 %v939_v33, %v630_v31 }
 0x13b   :  { %vm645_vm2 = vcmp.eq.s32.totalorder %v644_v34, %v1284_v50  ;;  %vm646_vm3 = vcmp.eq.s32.totalorder %v644_v34, %v1288_v52 }
 0x13c   :  { %v940_v38 = vsel %vm645_vm2, 1.0, %v1201_v56  ;;  %v941_v39 = vsel %vm646_vm3, 1.0, %v1201_v56 }
 0x13d   :  { %v651_v41 = vadd.f32 %v940_v38, %v640_v35  ;;  %v652_v42 = vadd.f32 %v941_v39, %v641_v36 }
 0x13f   :  { %v655_v40 = vpop.permute.xlu1 %654 }
 0x140   :  { %vm656_vm6 = vcmp.eq.s32.totalorder %v655_v40, %v1284_v50  ;;  %vm657_vm7 = vcmp.eq.s32.totalorder %v655_v40, %v1288_v52 }
 0x141   :  { %v942_v43 = vsel %vm656_vm6, 1.0, %v1201_v56  ;;  %v943_v44 = vsel %vm657_vm7, 1.0, %v1201_v56 }
 0x142   :  { %v662_v45 = vadd.f32 %v942_v43, %v651_v41  ;;  %v663_v47 = vadd.f32 %v943_v44, %v652_v42 }
 0x144   :  { %v677_v51 = vpop.permute.xlu1 %676  ;;  %v673_v54 = vadd.f32 %v944_v48, %v662_v45  ;;  %v674_v55 = vadd.f32 %v945_v49, %v663_v47 }
 0x145   :  { %vm678_vm8 = vcmp.eq.s32.totalorder %v677_v51, %v1284_v50  ;;  %vm679_vm9 = vcmp.eq.s32.totalorder %v677_v51, %v1288_v52 }
 0x146   :  { %v946_v57 = vsel %vm678_vm8, 1.0, %v1201_v56  ;;  %v947_v58 = vsel %vm679_vm9, 1.0, %v1201_v56 }
 0x147   :  { %v684_v60 = vadd.f32 %v946_v57, %v673_v54  ;;  %v685_v61 = vadd.f32 %v947_v58, %v674_v55 }
 0x149   :  { %v688_v59 = vpop.permute.xlu1 %687 }
 0x14a   :  { %vm689_vm12 = vcmp.eq.s32.totalorder %v688_v59, %v1284_v50  ;;  %vm690_vm13 = vcmp.eq.s32.totalorder %v688_v59, %v1288_v52 }
 0x14b   :  { %v948_v62 = vsel %vm689_vm12, 1.0, %v1201_v56  ;;  %v949_v46 = vsel %vm690_vm13, 1.0, %v1201_v56 }
 0x14c   :  { %v695_v1 = vadd.f32 %v948_v62, %v684_v60  ;;  %v696_v2 = vadd.f32 %v949_v46, %v685_v61 }
 0x14e   :  { %v706_v3 = vadd.f32 %v950_v63, %v695_v1  ;;  %v710_v4 = vpop.permute.xlu1 %709  ;;  %v707_v5 = vadd.f32 %v951_v0, %v696_v2 }
 0x14f   :  { %vm711_vm14 = vcmp.eq.s32.totalorder %v710_v4, %v1284_v50  ;;  %vm712_vm15 = vcmp.eq.s32.totalorder %v710_v4, %v1288_v52 }
 0x150   :  { %v952_v6 = vsel %vm711_vm14, 1.0, %v1201_v56  ;;  %v953_v7 = vsel %vm712_vm15, 1.0, %v1201_v56 }
 0x151   :  { %v717_v8 = vadd.f32 %v952_v6, %v706_v3  ;;  %v718_v9 = vadd.f32 %v953_v7, %v707_v5 }
 0x153   :  { %815 = vmatprep.mubr.f32.mxu0 %v718_v9 }
 0x154   :  { %816 = vmatmul.mubr.f32.vlgmr.msra.gmra.mrb[0].mxu0 %v717_v8 }
 0x227   :  { %v986_v10 = vpop.f32.mrb[0].mxu0 }
 0x228   :  { %v987_v11 = vpop.f32.mrb[1].mxu0 }
 0x229   :  { %v988_v12 = vadd.f32 %v987_v11, %v986_v10 }
 0x22b   :  { %821 = vst [vmem:[%s1676_s2] sm:$0xff] %v988_v12 }

</bundles_post_ra>
